<compile_context>
chip_gen: v7x
topology: tpu7x:2x2x1
jax: 0.10.0
libtpu: 0.0.40
codegen_flags: <defaults>
</compile_context>

<pallas_src>
import jax
import jax.numpy as jnp
import numpy as np
from jax.experimental import pallas as pl
from jax.experimental.pallas import tpu as pltpu


# ---------------------------------------------------------------------------
# In-kernel helpers
# ---------------------------------------------------------------------------
def _row_slab(img_ref, r0, rows, halo_top, halo_bot, H):
    """Rows [r0-halo_top, r0+rows+halo_bot) of img_ref[0] with rows outside [0, H)
    replaced by exact zeros.  img_ref block shape: (1, H, W, C)."""
    parts = []
    for k in range(halo_top, 0, -1):                       # rows r0-k
        idx = jnp.maximum(r0 - k, 0)
        row = img_ref[0, pl.ds(idx, 1), :, :]              # (1, W, C)
        parts.append(row * (r0 - k >= 0).astype(row.dtype))
    parts.append(img_ref[0, pl.ds(r0, rows), :, :])        # (rows, W, C)
    for k in range(rows, rows + halo_bot):                 # rows r0+k
        idx = jnp.minimum(r0 + k, H - 1)
        row = img_ref[0, pl.ds(idx, 1), :, :]
        parts.append(row * (r0 + k < H).astype(row.dtype))
    return jnp.concatenate(parts, axis=0)


def _pad_cols1(a):
    """Zero-pad one column on each side of axis 1 of a (R, W, C) array."""
    z = jnp.zeros((a.shape[0], 1, a.shape[2]), a.dtype)
    return jnp.concatenate([z, a, z], axis=1)


# ---------------------------------------------------------------------------
# Fused Pallas kernel: upsampled-x -> conv1 -> leaky -> conv2(cat skip) -> leaky
# ---------------------------------------------------------------------------
def _up_fused_kernel(x_ref, s_ref, w1_ref, b1_ref, w2_ref, b2_ref, o_ref):
    # x_ref : (1, H, W, Cin)    upsampled input, whole image (resident per batch)
    # s_ref : (1, H, W, Cs)     skip connection, whole image (resident per batch)
    # w1_ref: (9*Cin, Cout)     conv1 weight, im2col layout (tap-major, cin-minor)
    # b1_ref: (1, Cout)
    # w2_ref: (9*Cout+9*Cs, Cout)  conv2 weight: [conv1-act taps ; skip taps]
    # b2_ref: (1, Cout)
    # o_ref : (1, TH, W, Cout)  output row strip
    _, H, W, Cin = x_ref.shape
    Cs = s_ref.shape[3]
    _, TH, _, Cout = o_ref.shape
    r0 = pl.program_id(1) * TH                 # first output row of this strip

    # Input row slabs; rows beyond the image are the convs' zero padding.
    # conv1 is evaluated on TH+2 "extended" rows [r0-1, r0+TH+1) so conv2 gets its
    # +/-1 row halo without any HBM round trip; that needs x rows [r0-2, r0+TH+2).
    x_slab = _pad_cols1(_row_slab(x_ref, r0, TH, 2, 2, H))   # (TH+4, W+2, Cin)
    s_slab = _pad_cols1(_row_slab(s_ref, r0, TH, 1, 1, H))   # (TH+2, W+2, Cs)

    # ---- conv1 + bias + leaky_relu: one im2col matmul (K = 9*Cin) -------------
    m1 = (TH + 2) * W
    p1 = jnp.concatenate(
        [x_slab[dy:dy + TH + 2, dx:dx + W, :].reshape(m1, Cin)
         for dy in range(3) for dx in range(3)], axis=1)        # (m1, 9*Cin)
    y1 = jnp.dot(p1, w1_ref[...], preferred_element_type=jnp.float32)
    y1 = y1 + b1_ref[...]
    y1 = jnp.where(y1 >= 0, y1, 0.1 * y1)                       # leaky_relu(0.1)
    y1 = y1.reshape(TH + 2, W, Cout)

    # Extended rows outside the image are conv2's zero padding, not conv1 outputs:
    # force them to exact zero.
    row_id = jax.lax.broadcasted_iota(jnp.int32, (TH + 2, W, Cout), 0) + (r0 - 1)
    y1 = y1 * jnp.logical_and(row_id >= 0, row_id < H).astype(y1.dtype)
    y1 = _pad_cols1(y1)                                          # (TH+2, W+2, Cout)

    # ---- conv2(cat(y1, skip)) + bias + leaky_relu: one matmul (K = 9*(Cout+Cs)) -
    m2 = TH * W
    taps = [y1[dy:dy + TH, dx:dx + W, :].reshape(m2, Cout)
            for dy in range(3) for dx in range(3)]
    taps += [s_slab[dy:dy + TH, dx:dx + W, :].reshape(m2, Cs)
             for dy in range(3) for dx in range(3)]
    p2 = jnp.concatenate(taps, axis=1)                           # (m2, 9*(Cout+Cs))
    y2 = jnp.dot(p2, w2_ref[...], preferred_element_type=jnp.float32)
    y2 = y2 + b2_ref[...]
    y2 = jnp.where(y2 >= 0, y2, 0.1 * y2)                        # leaky_relu(0.1)
    o_ref[...] = y2.reshape(1, TH, W, Cout).astype(o_ref.dtype)


# ---------------------------------------------------------------------------
# Plain-JAX glue
# ---------------------------------------------------------------------------
def _bilinear_up2x_nhwc(x):
    """2x bilinear upsample matching torch F.interpolate(scale_factor=2,
    mode='bilinear', align_corners=False)."""
    N, H, W, C = x.shape
    xp = jnp.pad(x, ((0, 0), (1, 1), (0, 0), (0, 0)), mode="edge")
    re = 0.25 * xp[:, 0:H] + 0.75 * xp[:, 1:H + 1]          # even output rows
    ro = 0.75 * xp[:, 1:H + 1] + 0.25 * xp[:, 2:H + 2]      # odd output rows
    rows = jnp.stack([re, ro], axis=2).reshape(N, 2 * H, W, C)
    rp = jnp.pad(rows, ((0, 0), (0, 0), (1, 1), (0, 0)), mode="edge")
    ce = 0.25 * rp[:, :, 0:W] + 0.75 * rp[:, :, 1:W + 1]    # even output cols
    co = 0.75 * rp[:, :, 1:W + 1] + 0.25 * rp[:, :, 2:W + 2]
    return jnp.stack([ce, co], axis=3).reshape(N, 2 * H, 2 * W, C)


def _pick_strip_rows(H, max_rows):
    """Largest divisor of H that is <= max_rows (>= 1)."""
    th = max(1, min(H, max_rows))
    while H % th:
        th -= 1
    return th


def init_up_params(key, in_channels, out_channels):
    k1, k2, k3, k4 = jax.random.split(key, 4)
    # PyTorch conv weight layout (O, I, kH, kW).
    w1 = 0.1 * jax.random.normal(k1, (out_channels, in_channels, 3, 3), jnp.float32)
    b1 = 0.1 * jax.random.normal(k2, (out_channels,), jnp.float32)
    w2 = 0.1 * jax.random.normal(k3, (out_channels, 2 * out_channels, 3, 3), jnp.float32)
    b2 = 0.1 * jax.random.normal(k4, (out_channels,), jnp.float32)

    def im2col(w_oikk):
        # (O, I, 3, 3) -> (ky, kx, I, O) -> (9*I, O); row = (ky*3+kx)*I + i.
        o, i_, _, _ = w_oikk.shape
        return jnp.transpose(w_oikk, (2, 3, 1, 0)).reshape(9 * i_, o)

    return {
        "w1": im2col(w1),
        "b1": b1.reshape(1, out_channels),
        # conv2: first input-channel half acts on the conv1 activation, second on
        # the skip (torch cat order (x, skpCn)); stacked along K -> single matmul.
        "w2": jnp.concatenate([im2col(w2[:, :out_channels]),
                               im2col(w2[:, out_channels:])], axis=0),
        "b2": b2.reshape(1, out_channels),
        # raw PyTorch-layout copies kept for the silent reference check
        "_w1_raw": w1, "_b1_raw": b1, "_w2_raw": w2, "_b2_raw": b2,
    }


def up_forward(params, x_nchw, skp_nchw, *, max_strip_rows=64):
    """Up.forward.  x_nchw: (N, Cin, Hin, Win); skp_nchw: (N, Cout, 2Hin, 2Win)."""
    x = jnp.transpose(x_nchw, (0, 2, 3, 1))        # NHWC
    s = jnp.transpose(skp_nchw, (0, 2, 3, 1))
    x = _bilinear_up2x_nhwc(x)                     # (N, H, W, Cin)

    N, H, W, Cin = x.shape
    Cs = s.shape[-1]
    Cout = params["b1"].shape[-1]
    # Strip height: pick the largest divisor of H under the cap.  (On v7x, with
    # 64 MiB VMEM per TensorCore, size this roughly 2x smaller than on v5e/v6e.)
    TH = _pick_strip_rows(H, max_strip_rows)
    n_strips = H // TH

    out = pl.pallas_call(
        _up_fused_kernel,
        out_shape=jax.ShapeDtypeStruct((N, H, W, Cout), jnp.float32),
        grid=(N, n_strips),
        in_specs=[
            pl.BlockSpec((1, H, W, Cin), lambda n, i: (n, 0, 0, 0)),
            pl.BlockSpec((1, H, W, Cs), lambda n, i: (n, 0, 0, 0)),
            pl.BlockSpec((9 * Cin, Cout), lambda n, i: (0, 0)),
            pl.BlockSpec((1, Cout), lambda n, i: (0, 0)),
            pl.BlockSpec((9 * (Cout + Cs), Cout), lambda n, i: (0, 0)),
            pl.BlockSpec((1, Cout), lambda n, i: (0, 0)),
        ],
        out_specs=pl.BlockSpec((1, TH, W, Cout), lambda n, i: (n, i, 0, 0)),
        compiler_params=pltpu.CompilerParams(
            dimension_semantics=("parallel", "arbitrary"),
            vmem_limit_bytes=48 * 1024 * 1024),
    )(x, s, params["w1"], params["b1"], params["w2"], params["b2"])

    return jnp.transpose(out, (0, 3, 1, 2))        # back to NCHW


# ---------------------------------------------------------------------------
# Pure-JAX reference (silent correctness check)
# ---------------------------------------------------------------------------
def _up_reference(params, x_nchw, skp_nchw):
    def conv3x3(xx, w_oikk, b):
        y = jax.lax.conv_general_dilated(
            xx, w_oikk, window_strides=(1, 1), padding=((1, 1), (1, 1)),
            dimension_numbers=("NCHW", "OIHW", "NCHW"))
        return y + b[None, :, None, None]

    x = jnp.transpose(_bilinear_up2x_nhwc(jnp.transpose(x_nchw, (0, 2, 3, 1))),
                      (0, 3, 1, 2))
    x = conv3x3(x, params["_w1_raw"], params["_b1_raw"])
    x = jnp.where(x >= 0, x, 0.1 * x)
    x = conv3x3(jnp.concatenate([x, skp_nchw], axis=1),
                params["_w2_raw"], params["_b2_raw"])
    return jnp.where(x >= 0, x, 0.1 * x)


if __name__ == "__main__":
    key = jax.random.PRNGKey(0)
    k_params, k_x, k_s = jax.random.split(key, 3)

    N, in_channels, out_channels, Hin, Win = 2, 4, 8, 8, 8
    params = init_up_params(k_params, in_channels, out_channels)

    x = jax.random.normal(k_x, (N, in_channels, Hin, Win), jnp.float32)        # NCHW
    skp = jax.random.normal(k_s, (N, out_channels, 2 * Hin, 2 * Win), jnp.float32)

    ref = jax.block_until_ready(_up_reference(params, x, skp))

    # Multi-strip path (exercises the row-strip halo logic: first / middle / last
    # strips) and single-strip path (TH == H).
    out_a = jax.block_until_ready(up_forward(params, x, skp, max_strip_rows=4))
    out_b = jax.block_until_ready(up_forward(params, x, skp))

    assert out_a.shape == (N, out_channels, 2 * Hin, 2 * Win)
    np.testing.assert_allclose(np.asarray(out_a), np.asarray(ref),
                               rtol=1e-3, atol=1e-3)
    np.testing.assert_allclose(np.asarray(out_b), np.asarray(ref),
                               rtol=1e-3, atol=1e-3)
    print("KERNEL_OK")
</pallas_src>

<mosaic_0001>
module attributes {stable_mosaic.version = 11 : i64} {
  func.func @_up_fused_kernel(%arg0: i32, %arg1: i32, %arg2: memref<1x16x16x4xf32, #tpu.memory_space<vmem>>, %arg3: memref<1x16x16x8xf32, #tpu.memory_space<vmem>>, %arg4: memref<36x8xf32, #tpu.memory_space<vmem>>, %arg5: memref<1x8xf32, #tpu.memory_space<vmem>>, %arg6: memref<144x8xf32, #tpu.memory_space<vmem>>, %arg7: memref<1x8xf32, #tpu.memory_space<vmem>>, %arg8: memref<1x4x16x8xf32, #tpu.memory_space<vmem>>) attributes {dimension_semantics = [#tpu.dimension_semantics<parallel>, #tpu.dimension_semantics<arbitrary>], iteration_bounds = array<i64: 2, 4>, scalar_prefetch = 0 : i64, scratch_operands = 0 : i64, tpu.core_type = #tpu.core_type<tc>, window_params = [{transform_indices = @transform_0, window_bounds = array<i64: 1, 16, 16, 4>}, {transform_indices = @transform_1, window_bounds = array<i64: 1, 16, 16, 8>}, {pipeline_mode = #tpu.pipeline_mode<synchronous>, transform_indices = @transform_2, window_bounds = array<i64: 36, 8>}, {pipeline_mode = #tpu.pipeline_mode<synchronous>, transform_indices = @transform_3, window_bounds = array<i64: 1, 8>}, {pipeline_mode = #tpu.pipeline_mode<synchronous>, transform_indices = @transform_4, window_bounds = array<i64: 144, 8>}, {pipeline_mode = #tpu.pipeline_mode<synchronous>, transform_indices = @transform_5, window_bounds = array<i64: 1, 8>}, {transform_indices = @transform_6, window_bounds = array<i64: 1, 4, 16, 8>}]} {
    %c4_i32 = arith.constant 4 : i32
    %0 = arith.muli %arg1, %c4_i32 : i32
    %c2_i32 = arith.constant 2 : i32
    %1 = arith.subi %0, %c2_i32 : i32
    %c0_i32 = arith.constant 0 : i32
    %2 = arith.maxsi %1, %c0_i32 : i32
    %c0 = arith.constant 0 : index
    %3 = arith.index_cast %2 : i32 to index
    %c0_0 = arith.constant 0 : index
    %c0_1 = arith.constant 0 : index
    %4 = vector.load %arg2[%c0, %3, %c0_0, %c0_1] : memref<1x16x16x4xf32, #tpu.memory_space<vmem>>, vector<1x1x16x4xf32>
    %5 = vector.shape_cast %4 : vector<1x1x16x4xf32> to vector<1x16x4xf32>
    %c2_i32_2 = arith.constant 2 : i32
    %6 = arith.subi %0, %c2_i32_2 : i32
    %c0_i32_3 = arith.constant 0 : i32
    %7 = arith.cmpi sge, %6, %c0_i32_3 : i32
    %8 = arith.extui %7 : i1 to i32
    %9 = arith.sitofp %8 : i32 to f32
    %10 = vector.broadcast %9 : f32 to vector<1x16x4xf32>
    %11 = arith.mulf %5, %10 : vector<1x16x4xf32>
    %c1_i32 = arith.constant 1 : i32
    %12 = arith.subi %0, %c1_i32 : i32
    %c0_i32_4 = arith.constant 0 : i32
    %13 = arith.maxsi %12, %c0_i32_4 : i32
    %c0_5 = arith.constant 0 : index
    %14 = arith.index_cast %13 : i32 to index
    %c0_6 = arith.constant 0 : index
    %c0_7 = arith.constant 0 : index
    %15 = vector.load %arg2[%c0_5, %14, %c0_6, %c0_7] : memref<1x16x16x4xf32, #tpu.memory_space<vmem>>, vector<1x1x16x4xf32>
    %16 = vector.shape_cast %15 : vector<1x1x16x4xf32> to vector<1x16x4xf32>
    %c1_i32_8 = arith.constant 1 : i32
    %17 = arith.subi %0, %c1_i32_8 : i32
    %c0_i32_9 = arith.constant 0 : i32
    %18 = arith.cmpi sge, %17, %c0_i32_9 : i32
    %19 = arith.extui %18 : i1 to i32
    %20 = arith.sitofp %19 : i32 to f32
    %21 = vector.broadcast %20 : f32 to vector<1x16x4xf32>
    %22 = arith.mulf %16, %21 : vector<1x16x4xf32>
    %c0_10 = arith.constant 0 : index
    %23 = arith.index_cast %0 : i32 to index
    %c0_11 = arith.constant 0 : index
    %c0_12 = arith.constant 0 : index
    %24 = vector.load %arg2[%c0_10, %23, %c0_11, %c0_12] : memref<1x16x16x4xf32, #tpu.memory_space<vmem>>, vector<1x4x16x4xf32>
    %25 = vector.shape_cast %24 : vector<1x4x16x4xf32> to vector<4x16x4xf32>
    %c4_i32_13 = arith.constant 4 : i32
    %26 = arith.addi %0, %c4_i32_13 : i32
    %c15_i32 = arith.constant 15 : i32
    %27 = arith.minsi %26, %c15_i32 : i32
    %c0_14 = arith.constant 0 : index
    %28 = arith.index_cast %27 : i32 to index
    %c0_15 = arith.constant 0 : index
    %c0_16 = arith.constant 0 : index
    %29 = vector.load %arg2[%c0_14, %28, %c0_15, %c0_16] : memref<1x16x16x4xf32, #tpu.memory_space<vmem>>, vector<1x1x16x4xf32>
    %30 = vector.shape_cast %29 : vector<1x1x16x4xf32> to vector<1x16x4xf32>
    %c4_i32_17 = arith.constant 4 : i32
    %31 = arith.addi %0, %c4_i32_17 : i32
    %c16_i32 = arith.constant 16 : i32
    %32 = arith.cmpi slt, %31, %c16_i32 : i32
    %33 = arith.extui %32 : i1 to i32
    %34 = arith.sitofp %33 : i32 to f32
    %35 = vector.broadcast %34 : f32 to vector<1x16x4xf32>
    %36 = arith.mulf %30, %35 : vector<1x16x4xf32>
    %c5_i32 = arith.constant 5 : i32
    %37 = arith.addi %0, %c5_i32 : i32
    %c15_i32_18 = arith.constant 15 : i32
    %38 = arith.minsi %37, %c15_i32_18 : i32
    %c0_19 = arith.constant 0 : index
    %39 = arith.index_cast %38 : i32 to index
    %c0_20 = arith.constant 0 : index
    %c0_21 = arith.constant 0 : index
    %40 = vector.load %arg2[%c0_19, %39, %c0_20, %c0_21] : memref<1x16x16x4xf32, #tpu.memory_space<vmem>>, vector<1x1x16x4xf32>
    %41 = vector.shape_cast %40 : vector<1x1x16x4xf32> to vector<1x16x4xf32>
    %c5_i32_22 = arith.constant 5 : i32
    %42 = arith.addi %0, %c5_i32_22 : i32
    %c16_i32_23 = arith.constant 16 : i32
    %43 = arith.cmpi slt, %42, %c16_i32_23 : i32
    %44 = arith.extui %43 : i1 to i32
    %45 = arith.sitofp %44 : i32 to f32
    %46 = vector.broadcast %45 : f32 to vector<1x16x4xf32>
    %47 = arith.mulf %41, %46 : vector<1x16x4xf32>
    %48 = tpu.concatenate %11, %22, %25, %36, %47 in 0 : vector<1x16x4xf32>, vector<1x16x4xf32>, vector<4x16x4xf32>, vector<1x16x4xf32>, vector<1x16x4xf32> -> vector<8x16x4xf32>
    %cst = arith.constant 0.000000e+00 : f32
    %49 = vector.broadcast %cst : f32 to vector<8x1x4xf32>
    %50 = tpu.concatenate %49, %48, %49 in 1 : vector<8x1x4xf32>, vector<8x16x4xf32>, vector<8x1x4xf32> -> vector<8x18x4xf32>
    %c1_i32_24 = arith.constant 1 : i32
    %51 = arith.subi %0, %c1_i32_24 : i32
    %c0_i32_25 = arith.constant 0 : i32
    %52 = arith.maxsi %51, %c0_i32_25 : i32
    %c0_26 = arith.constant 0 : index
    %53 = arith.index_cast %52 : i32 to index
    %c0_27 = arith.constant 0 : index
    %c0_28 = arith.constant 0 : index
    %54 = vector.load %arg3[%c0_26, %53, %c0_27, %c0_28] : memref<1x16x16x8xf32, #tpu.memory_space<vmem>>, vector<1x1x16x8xf32>
    %55 = vector.shape_cast %54 : vector<1x1x16x8xf32> to vector<1x16x8xf32>
    %c1_i32_29 = arith.constant 1 : i32
    %56 = arith.subi %0, %c1_i32_29 : i32
    %c0_i32_30 = arith.constant 0 : i32
    %57 = arith.cmpi sge, %56, %c0_i32_30 : i32
    %58 = arith.extui %57 : i1 to i32
    %59 = arith.sitofp %58 : i32 to f32
    %60 = vector.broadcast %59 : f32 to vector<1x16x8xf32>
    %61 = arith.mulf %55, %60 : vector<1x16x8xf32>
    %c0_31 = arith.constant 0 : index
    %62 = arith.index_cast %0 : i32 to index
    %c0_32 = arith.constant 0 : index
    %c0_33 = arith.constant 0 : index
    %63 = vector.load %arg3[%c0_31, %62, %c0_32, %c0_33] : memref<1x16x16x8xf32, #tpu.memory_space<vmem>>, vector<1x4x16x8xf32>
    %64 = vector.shape_cast %63 : vector<1x4x16x8xf32> to vector<4x16x8xf32>
    %c4_i32_34 = arith.constant 4 : i32
    %65 = arith.addi %0, %c4_i32_34 : i32
    %c15_i32_35 = arith.constant 15 : i32
    %66 = arith.minsi %65, %c15_i32_35 : i32
    %c0_36 = arith.constant 0 : index
    %67 = arith.index_cast %66 : i32 to index
    %c0_37 = arith.constant 0 : index
    %c0_38 = arith.constant 0 : index
    %68 = vector.load %arg3[%c0_36, %67, %c0_37, %c0_38] : memref<1x16x16x8xf32, #tpu.memory_space<vmem>>, vector<1x1x16x8xf32>
    %69 = vector.shape_cast %68 : vector<1x1x16x8xf32> to vector<1x16x8xf32>
    %c4_i32_39 = arith.constant 4 : i32
    %70 = arith.addi %0, %c4_i32_39 : i32
    %c16_i32_40 = arith.constant 16 : i32
    %71 = arith.cmpi slt, %70, %c16_i32_40 : i32
    %72 = arith.extui %71 : i1 to i32
    %73 = arith.sitofp %72 : i32 to f32
    %74 = vector.broadcast %73 : f32 to vector<1x16x8xf32>
    %75 = arith.mulf %69, %74 : vector<1x16x8xf32>
    %76 = tpu.concatenate %61, %64, %75 in 0 : vector<1x16x8xf32>, vector<4x16x8xf32>, vector<1x16x8xf32> -> vector<6x16x8xf32>
    %cst_41 = arith.constant 0.000000e+00 : f32
    %77 = vector.broadcast %cst_41 : f32 to vector<6x1x8xf32>
    %78 = tpu.concatenate %77, %76, %77 in 1 : vector<6x1x8xf32>, vector<6x16x8xf32>, vector<6x1x8xf32> -> vector<6x18x8xf32>
    %79 = vector.extract_strided_slice %50 {offsets = [0, 0, 0], sizes = [6, 16, 4], strides = [1, 1, 1]} : vector<8x18x4xf32> to vector<6x16x4xf32>
    %80 = vector.shape_cast %79 : vector<6x16x4xf32> to vector<96x4xf32>
    %81 = vector.extract_strided_slice %50 {offsets = [0, 1, 0], sizes = [6, 16, 4], strides = [1, 1, 1]} : vector<8x18x4xf32> to vector<6x16x4xf32>
    %82 = vector.shape_cast %81 : vector<6x16x4xf32> to vector<96x4xf32>
    %83 = vector.extract_strided_slice %50 {offsets = [0, 2, 0], sizes = [6, 16, 4], strides = [1, 1, 1]} : vector<8x18x4xf32> to vector<6x16x4xf32>
    %84 = vector.shape_cast %83 : vector<6x16x4xf32> to vector<96x4xf32>
    %85 = vector.extract_strided_slice %50 {offsets = [1, 0, 0], sizes = [6, 16, 4], strides = [1, 1, 1]} : vector<8x18x4xf32> to vector<6x16x4xf32>
    %86 = vector.shape_cast %85 : vector<6x16x4xf32> to vector<96x4xf32>
    %87 = vector.extract_strided_slice %50 {offsets = [1, 1, 0], sizes = [6, 16, 4], strides = [1, 1, 1]} : vector<8x18x4xf32> to vector<6x16x4xf32>
    %88 = vector.shape_cast %87 : vector<6x16x4xf32> to vector<96x4xf32>
    %89 = vector.extract_strided_slice %50 {offsets = [1, 2, 0], sizes = [6, 16, 4], strides = [1, 1, 1]} : vector<8x18x4xf32> to vector<6x16x4xf32>
    %90 = vector.shape_cast %89 : vector<6x16x4xf32> to vector<96x4xf32>
    %91 = vector.extract_strided_slice %50 {offsets = [2, 0, 0], sizes = [6, 16, 4], strides = [1, 1, 1]} : vector<8x18x4xf32> to vector<6x16x4xf32>
    %92 = vector.shape_cast %91 : vector<6x16x4xf32> to vector<96x4xf32>
    %93 = vector.extract_strided_slice %50 {offsets = [2, 1, 0], sizes = [6, 16, 4], strides = [1, 1, 1]} : vector<8x18x4xf32> to vector<6x16x4xf32>
    %94 = vector.shape_cast %93 : vector<6x16x4xf32> to vector<96x4xf32>
    %95 = vector.extract_strided_slice %50 {offsets = [2, 2, 0], sizes = [6, 16, 4], strides = [1, 1, 1]} : vector<8x18x4xf32> to vector<6x16x4xf32>
    %96 = vector.shape_cast %95 : vector<6x16x4xf32> to vector<96x4xf32>
    %97 = tpu.concatenate %80, %82, %84, %86, %88, %90, %92, %94, %96 in 1 : vector<96x4xf32>, vector<96x4xf32>, vector<96x4xf32>, vector<96x4xf32>, vector<96x4xf32>, vector<96x4xf32>, vector<96x4xf32>, vector<96x4xf32>, vector<96x4xf32> -> vector<96x36xf32>
    %c0_42 = arith.constant 0 : index
    %c0_43 = arith.constant 0 : index
    %98 = vector.load %arg4[%c0_42, %c0_43] : memref<36x8xf32, #tpu.memory_space<vmem>>, vector<36x8xf32>
    %cst_44 = arith.constant dense<0.000000e+00> : vector<96x8xf32>
    %99 = tpu.matmul %97, %98, %cst_44 {dimension_numbers = #tpu.dot_dimension_numbers<[1], [0], [0], [1], [0, 0, 1, 1], [], []>} : vector<96x36xf32>, vector<36x8xf32>, vector<96x8xf32> -> vector<96x8xf32>
    %c0_45 = arith.constant 0 : index
    %c0_46 = arith.constant 0 : index
    %100 = vector.load %arg5[%c0_45, %c0_46] : memref<1x8xf32, #tpu.memory_space<vmem>>, vector<1x8xf32>
    %101 = vector.broadcast %100 : vector<1x8xf32> to vector<96x8xf32>
    %102 = arith.addf %99, %101 : vector<96x8xf32>
    %cst_47 = arith.constant 0.000000e+00 : f32
    %103 = vector.broadcast %cst_47 : f32 to vector<96x8xf32>
    %104 = arith.cmpf oge, %102, %103 : vector<96x8xf32>
    %cst_48 = arith.constant 1.000000e-01 : f32
    %105 = vector.broadcast %cst_48 : f32 to vector<96x8xf32>
    %106 = arith.mulf %105, %102 : vector<96x8xf32>
    %107 = arith.select %104, %102, %106 : vector<96x8xi1>, vector<96x8xf32>
    %108 = vector.shape_cast %107 : vector<96x8xf32> to vector<6x16x8xf32>
    %109 = tpu.iota {dimensions = array<i32: 0>} : vector<6x16x8xi32>
    %c1_i32_49 = arith.constant 1 : i32
    %110 = arith.subi %0, %c1_i32_49 : i32
    %111 = vector.broadcast %110 : i32 to vector<6x16x8xi32>
    %112 = arith.addi %109, %111 : vector<6x16x8xi32>
    %c0_i32_50 = arith.constant 0 : i32
    %113 = vector.broadcast %c0_i32_50 : i32 to vector<6x16x8xi32>
    %114 = arith.cmpi sge, %112, %113 : vector<6x16x8xi32>
    %c16_i32_51 = arith.constant 16 : i32
    %115 = vector.broadcast %c16_i32_51 : i32 to vector<6x16x8xi32>
    %116 = arith.cmpi slt, %112, %115 : vector<6x16x8xi32>
    %117 = arith.andi %114, %116 : vector<6x16x8xi1>
    %118 = arith.extui %117 : vector<6x16x8xi1> to vector<6x16x8xi32>
    %119 = arith.sitofp %118 : vector<6x16x8xi32> to vector<6x16x8xf32>
    %120 = arith.mulf %108, %119 : vector<6x16x8xf32>
    %cst_52 = arith.constant 0.000000e+00 : f32
    %121 = vector.broadcast %cst_52 : f32 to vector<6x1x8xf32>
    %122 = tpu.concatenate %121, %120, %121 in 1 : vector<6x1x8xf32>, vector<6x16x8xf32>, vector<6x1x8xf32> -> vector<6x18x8xf32>
    %123 = vector.extract_strided_slice %122 {offsets = [0, 0, 0], sizes = [4, 16, 8], strides = [1, 1, 1]} : vector<6x18x8xf32> to vector<4x16x8xf32>
    %124 = vector.shape_cast %123 : vector<4x16x8xf32> to vector<64x8xf32>
    %125 = vector.extract_strided_slice %122 {offsets = [0, 1, 0], sizes = [4, 16, 8], strides = [1, 1, 1]} : vector<6x18x8xf32> to vector<4x16x8xf32>
    %126 = vector.shape_cast %125 : vector<4x16x8xf32> to vector<64x8xf32>
    %127 = vector.extract_strided_slice %122 {offsets = [0, 2, 0], sizes = [4, 16, 8], strides = [1, 1, 1]} : vector<6x18x8xf32> to vector<4x16x8xf32>
    %128 = vector.shape_cast %127 : vector<4x16x8xf32> to vector<64x8xf32>
    %129 = vector.extract_strided_slice %122 {offsets = [1, 0, 0], sizes = [4, 16, 8], strides = [1, 1, 1]} : vector<6x18x8xf32> to vector<4x16x8xf32>
    %130 = vector.shape_cast %129 : vector<4x16x8xf32> to vector<64x8xf32>
    %131 = vector.extract_strided_slice %122 {offsets = [1, 1, 0], sizes = [4, 16, 8], strides = [1, 1, 1]} : vector<6x18x8xf32> to vector<4x16x8xf32>
    %132 = vector.shape_cast %131 : vector<4x16x8xf32> to vector<64x8xf32>
    %133 = vector.extract_strided_slice %122 {offsets = [1, 2, 0], sizes = [4, 16, 8], strides = [1, 1, 1]} : vector<6x18x8xf32> to vector<4x16x8xf32>
    %134 = vector.shape_cast %133 : vector<4x16x8xf32> to vector<64x8xf32>
    %135 = vector.extract_strided_slice %122 {offsets = [2, 0, 0], sizes = [4, 16, 8], strides = [1, 1, 1]} : vector<6x18x8xf32> to vector<4x16x8xf32>
    %136 = vector.shape_cast %135 : vector<4x16x8xf32> to vector<64x8xf32>
    %137 = vector.extract_strided_slice %122 {offsets = [2, 1, 0], sizes = [4, 16, 8], strides = [1, 1, 1]} : vector<6x18x8xf32> to vector<4x16x8xf32>
    %138 = vector.shape_cast %137 : vector<4x16x8xf32> to vector<64x8xf32>
    %139 = vector.extract_strided_slice %122 {offsets = [2, 2, 0], sizes = [4, 16, 8], strides = [1, 1, 1]} : vector<6x18x8xf32> to vector<4x16x8xf32>
    %140 = vector.shape_cast %139 : vector<4x16x8xf32> to vector<64x8xf32>
    %141 = vector.extract_strided_slice %78 {offsets = [0, 0, 0], sizes = [4, 16, 8], strides = [1, 1, 1]} : vector<6x18x8xf32> to vector<4x16x8xf32>
    %142 = vector.shape_cast %141 : vector<4x16x8xf32> to vector<64x8xf32>
    %143 = vector.extract_strided_slice %78 {offsets = [0, 1, 0], sizes = [4, 16, 8], strides = [1, 1, 1]} : vector<6x18x8xf32> to vector<4x16x8xf32>
    %144 = vector.shape_cast %143 : vector<4x16x8xf32> to vector<64x8xf32>
    %145 = vector.extract_strided_slice %78 {offsets = [0, 2, 0], sizes = [4, 16, 8], strides = [1, 1, 1]} : vector<6x18x8xf32> to vector<4x16x8xf32>
    %146 = vector.shape_cast %145 : vector<4x16x8xf32> to vector<64x8xf32>
    %147 = vector.extract_strided_slice %78 {offsets = [1, 0, 0], sizes = [4, 16, 8], strides = [1, 1, 1]} : vector<6x18x8xf32> to vector<4x16x8xf32>
    %148 = vector.shape_cast %147 : vector<4x16x8xf32> to vector<64x8xf32>
    %149 = vector.extract_strided_slice %78 {offsets = [1, 1, 0], sizes = [4, 16, 8], strides = [1, 1, 1]} : vector<6x18x8xf32> to vector<4x16x8xf32>
    %150 = vector.shape_cast %149 : vector<4x16x8xf32> to vector<64x8xf32>
    %151 = vector.extract_strided_slice %78 {offsets = [1, 2, 0], sizes = [4, 16, 8], strides = [1, 1, 1]} : vector<6x18x8xf32> to vector<4x16x8xf32>
    %152 = vector.shape_cast %151 : vector<4x16x8xf32> to vector<64x8xf32>
    %153 = vector.extract_strided_slice %78 {offsets = [2, 0, 0], sizes = [4, 16, 8], strides = [1, 1, 1]} : vector<6x18x8xf32> to vector<4x16x8xf32>
    %154 = vector.shape_cast %153 : vector<4x16x8xf32> to vector<64x8xf32>
    %155 = vector.extract_strided_slice %78 {offsets = [2, 1, 0], sizes = [4, 16, 8], strides = [1, 1, 1]} : vector<6x18x8xf32> to vector<4x16x8xf32>
    %156 = vector.shape_cast %155 : vector<4x16x8xf32> to vector<64x8xf32>
    %157 = vector.extract_strided_slice %78 {offsets = [2, 2, 0], sizes = [4, 16, 8], strides = [1, 1, 1]} : vector<6x18x8xf32> to vector<4x16x8xf32>
    %158 = vector.shape_cast %157 : vector<4x16x8xf32> to vector<64x8xf32>
    %159 = tpu.concatenate %124, %126, %128, %130, %132, %134, %136, %138, %140, %142, %144, %146, %148, %150, %152, %154 in 1 : vector<64x8xf32>, vector<64x8xf32>, vector<64x8xf32>, vector<64x8xf32>, vector<64x8xf32>, vector<64x8xf32>, vector<64x8xf32>, vector<64x8xf32>, vector<64x8xf32>, vector<64x8xf32>, vector<64x8xf32>, vector<64x8xf32>, vector<64x8xf32>, vector<64x8xf32>, vector<64x8xf32>, vector<64x8xf32> -> vector<64x128xf32>
    %160 = tpu.concatenate %156, %158 in 1 : vector<64x8xf32>, vector<64x8xf32> -> vector<64x16xf32>
    %161 = tpu.concatenate %159, %160 in 1 : vector<64x128xf32>, vector<64x16xf32> -> vector<64x144xf32>
    %c0_53 = arith.constant 0 : index
    %c0_54 = arith.constant 0 : index
    %162 = vector.load %arg6[%c0_53, %c0_54] : memref<144x8xf32, #tpu.memory_space<vmem>>, vector<144x8xf32>
    %cst_55 = arith.constant dense<0.000000e+00> : vector<64x8xf32>
    %163 = tpu.matmul %161, %162, %cst_55 {dimension_numbers = #tpu.dot_dimension_numbers<[1], [0], [0], [1], [0, 0, 1, 1], [], []>} : vector<64x144xf32>, vector<144x8xf32>, vector<64x8xf32> -> vector<64x8xf32>
    %c0_56 = arith.constant 0 : index
    %c0_57 = arith.constant 0 : index
    %164 = vector.load %arg7[%c0_56, %c0_57] : memref<1x8xf32, #tpu.memory_space<vmem>>, vector<1x8xf32>
    %165 = vector.broadcast %164 : vector<1x8xf32> to vector<64x8xf32>
    %166 = arith.addf %163, %165 : vector<64x8xf32>
    %cst_58 = arith.constant 0.000000e+00 : f32
    %167 = vector.broadcast %cst_58 : f32 to vector<64x8xf32>
    %168 = arith.cmpf oge, %166, %167 : vector<64x8xf32>
    %cst_59 = arith.constant 1.000000e-01 : f32
    %169 = vector.broadcast %cst_59 : f32 to vector<64x8xf32>
    %170 = arith.mulf %169, %166 : vector<64x8xf32>
    %171 = arith.select %168, %166, %170 : vector<64x8xi1>, vector<64x8xf32>
    %172 = vector.shape_cast %171 : vector<64x8xf32> to vector<1x4x16x8xf32>
    %c0_60 = arith.constant 0 : index
    %c0_61 = arith.constant 0 : index
    %c0_62 = arith.constant 0 : index
    %c0_63 = arith.constant 0 : index
    %173 = vector.load %arg8[%c0_60, %c0_61, %c0_62, %c0_63] : memref<1x4x16x8xf32, #tpu.memory_space<vmem>>, vector<1x4x16x8xf32>
    tpu.vector_store %arg8[%c0_60, %c0_61, %c0_62, %c0_63], %172 {strides = array<i32>} : memref<1x4x16x8xf32, #tpu.memory_space<vmem>>, vector<1x4x16x8xf32>,
    return
  }
  func.func @transform_0(%arg0: i32, %arg1: i32) -> (i32, i32, i32, i32) {
    %c0_i32 = arith.constant 0 : i32
    %c0_i32_0 = arith.constant 0 : i32
    %c0_i32_1 = arith.constant 0 : i32
    %c0_i32_2 = arith.constant 0 : i32
    return %arg0, %c0_i32, %c0_i32_0, %c0_i32_1 : i32, i32, i32, i32
  }
  func.func @transform_1(%arg0: i32, %arg1: i32) -> (i32, i32, i32, i32) {
    %c0_i32 = arith.constant 0 : i32
    %c0_i32_0 = arith.constant 0 : i32
    %c0_i32_1 = arith.constant 0 : i32
    %c0_i32_2 = arith.constant 0 : i32
    return %arg0, %c0_i32, %c0_i32_0, %c0_i32_1 : i32, i32, i32, i32
  }
  func.func @transform_2(%arg0: i32, %arg1: i32) -> (i32, i32) {
    %c0_i32 = arith.constant 0 : i32
    %c0_i32_0 = arith.constant 0 : i32
    %c0_i32_1 = arith.constant 0 : i32
    return %c0_i32, %c0_i32_0 : i32, i32
  }
  func.func @transform_3(%arg0: i32, %arg1: i32) -> (i32, i32) {
    %c0_i32 = arith.constant 0 : i32
    %c0_i32_0 = arith.constant 0 : i32
    %c0_i32_1 = arith.constant 0 : i32
    return %c0_i32, %c0_i32_0 : i32, i32
  }
  func.func @transform_4(%arg0: i32, %arg1: i32) -> (i32, i32) {
    %c0_i32 = arith.constant 0 : i32
    %c0_i32_0 = arith.constant 0 : i32
    %c0_i32_1 = arith.constant 0 : i32
    return %c0_i32, %c0_i32_0 : i32, i32
  }
  func.func @transform_5(%arg0: i32, %arg1: i32) -> (i32, i32) {
    %c0_i32 = arith.constant 0 : i32
    %c0_i32_0 = arith.constant 0 : i32
    %c0_i32_1 = arith.constant 0 : i32
    return %c0_i32, %c0_i32_0 : i32, i32
  }
  func.func @transform_6(%arg0: i32, %arg1: i32) -> (i32, i32, i32, i32) {
    %c0_i32 = arith.constant 0 : i32
    %c0_i32_0 = arith.constant 0 : i32
    %c0_i32_1 = arith.constant 0 : i32
    return %arg0, %arg1, %c0_i32, %c0_i32_0 : i32, i32, i32, i32
  }
}

</mosaic_0001>

<bundles_post_ra>
// kernel: tpu_custom_call.1
= control target key start
LH: loop header
LB: loop body
LE: loop exit
PB: predicated region body
PF: predicated region fallthrough
CT: control target
= control target key end

     0   :  { %s2911_s21 = smov 0   ;;  %s2913_s22 = smov 0   ;;  %s4436_s0 = inlined_call_operand.vmem [shape: f32[2,16,16,4], index: 0, kind: input, shape index: {}]   ;;  %s4437_s1 = inlined_call_operand.vmem [shape: f32[2,16,16,8], index: 1, kind: input, shape index: {}]   ;;  %s4438_s2 = inlined_call_operand.vmem [shape: f32[36,8], index: 2, kind: input, shape index: {}]   ;;  %s4439_s3 = inlined_call_operand.vmem [shape: f32[1,8], index: 3, kind: input, shape index: {}]   ;;  %s4440_s4 = inlined_call_operand.vmem [shape: f32[144,8], index: 4, kind: input, shape index: {}]   ;;  %s4441_s5 = inlined_call_operand.vmem [shape: f32[1,8], index: 5, kind: input, shape index: {}]   ;;  %s4442_s6 = inlined_call_operand.vmem [shape: f32[2,16,16,8], index: 6, kind: output, shape index: {}]  }
   0x1   :  { %s2915_s23 = smov 0   ;;  %s2917_s24 = smov 0  }
   0x2   :  { %s2919_s25 = smov 0  }
   0x3 LB: > { %s25_s26 = sadd.s32 1, %s2845_s23  ;;  %s28_s27 = sadd.s32 1, %s2849_s24  ;;  %s2853_s25 = sphi %s2919_s25, %s16_s25   ;;  %s2849_s24 = sphi %s2917_s24, %s4496_s24   ;;  %s2845_s23 = sphi %s2915_s23, %s4495_s23   ;;  %s2841_s22 = sphi %s2913_s22, %s4494_s22   ;;  %s2837_s21 = sphi %s2911_s21, %s4493_s21  }
   0x4   : > { %p26_p0 = scmp.ge.s32.totalorder %s25_s26, 4  ;;  %p2305_p1 = scmp.ge.s32.totalorder %s2853_s25, 1 }
   0x5   : > { %p236_p2 = scmp.lt.s32.totalorder %s2853_s25, 9 }
   0x6   : > { %s4498_s26 = smov (%p26_p0, %s25_s26), 0  ;;  %s4500_s27 = smov (!%p26_p0, %s28_s27), %s2849_s24 }
   0x7   : > { %p237_p3 = pnand %p2305_p1, %p236_p2  ;;  %p30_p4 = scmp.ge.s32.totalorder %s4500_s27, 2 }
   0x9   : > { %s4502_s27 = smov (%p30_p4, %s4500_s27), 0  ;;  %240 = sbr.rel (%p237_p3) target bundleno = 925 (0x39d), region = 44 }
  0x10   : > { %p276_p5 = scmp.lt.s32.totalorder %s2841_s22, 1  ;;  %s2944_s28 = sshll.u32 %s2837_s21, 2  ;;  %vm376_vm0 = vcmask 1040384   ;;  %vm555_vm1 = vcmask 1045504   ;;  %vm524_vm2 = vcmask 1046528   ;;  %v1002_v50 = vld [vmem:[%s4438_s2] sm:$0xff] }
  0x11   : > { %s2949_s29 = sadd.s32 4294967295, %s2944_s28  ;;  %s2355_s13 = sshll.u32 %s2837_s21, 6  ;;  %v1003_v51 = vld [vmem:[%s4438_s2 + $0x8] sm:$0xff]  ;;  %v1004_v55 = vld [vmem:[%s4438_s2 + $0x10] sm:$0xff]  ;;  %v1005_v56 = vld [vmem:[%s4438_s2 + $0x18] sm:$0xff]  ;;  %vm1051_vm3 = vcmask 1043456  }
  0x12   : > { %s4504_s22 = smov (!%p276_p5, %s2841_s22), 1  ;;  %p312_p6 = scmp.gt.s32.totalorder %s2949_s29, 0  ;;  %v2401_v52 = vpack.c.bf16 %v1003_v51, %v1002_v50  ;;  %v2405_v58 = vpack.c.bf16 %v1005_v56, %v1004_v55  ;;  %v1006_v60 = vld [vmem:[%s4438_s2 + $0x20] sm:$0xf]  ;;  %vm898_vm4 = vcmask 31744   ;;  %vm911_vm5 = vcmask 64512  }
  0x13   : > { %s2353_s30 = sshll.u32 %s4504_s22, 8  ;;  %p318_p7 = scmp.ge.s32.totalorder %s2949_s29, 0  ;;  %vm924_vm6 = vcmask 97280   ;;  %vm937_vm7 = vcmask 130048   ;;  %vm950_vm8 = vcmask 162816   ;;  %vm963_vm9 = vcmask 195584  }
  0x14   : > { %s2957_s9 = scalar_lea.vmem %s4436_s0, %s2353_s30  ;;  %s2962_s12 = scalar_lea.vmem %s4437_s1, %s2353_s30  ;;  %2402 = vmatprep.subr.bf16.mxu0 %v2401_v52  ;;  %vm976_vm10 = vcmask 228352   ;;  %vm989_vm11 = vcmask 261120   ;;  %vm1014_vm12 = vcmask 293888  }
  0x15   : > { %s313_s14 = scalar_select %p312_p6, %s2949_s29, 0  ;;  %2404 = vmatpush3.bf16.msra.mxu0 %v2401_v52 }
  0x16   : > { %s319_s15 = scalar_select %p318_p7, 1, 0  ;;  %2406 = vmatprep.subr.bf16.mxu0 %v2405_v58 }
  0x17   : > { %s2318_s16 = sshll.u32 %s313_s14, 4  ;;  %s2969_s17 = scalar_lea.vmem %s2962_s12, %s2355_s13 }
  0x18   : > { %s315_s18 = scalar_lea.vmem %s2957_s9, %s2318_s16  ;;  %s320_s19 = scvt.s32.f32 %s319_s15 }
  0x19   : > { %v316_v0 = vld [vmem:[%s315_s18] sm:$0xff]  ;;  %v317_v1 = vld [vmem:[%s315_s18 + $0x8] sm:$0xff]  ;;  %s439_s20 = scalar_lea.vmem %s2962_s12, %s2318_s16  ;;  %s2315_s7 = sadd.s32 4294967294, %s2944_s28  ;;  %2408 = vmatpush3.bf16.msra.mxu0 %v2405_v58 }
  0x1a   : > { %v321_v2 = vstv %s320_s19  ;;  %v440_v3 = vld [vmem:[%s439_s20] sm:$0xff]  ;;  %v441_v4 = vld [vmem:[%s439_s20 + $0x8] sm:$0xff]  ;;  %p299_p8 = scmp.gt.s32.totalorder %s2315_s7, 0  ;;  %p305_p9 = scmp.ge.s32.totalorder %s2315_s7, 0  ;;  %2381 = vmatprep.subr.msk.mxu0 %vm1051_vm3, %v1006_v60 }
  0x1b   : > { %v322_v5 = vmul.f32 %v321_v2, %v316_v0  ;;  %v2974_v6 = vmul.f32 %v440_v3, %v321_v2  ;;  %v2976_v7 = vmul.f32 %v441_v4, %v321_v2  ;;  %v323_v8 = vmul.f32 %v321_v2, %v317_v1  ;;  %s2855_s10 = smov 12   ;;  %s4446_s15 = smov 8  }
  0x1c   : > { %s4506_s7 = smov (!%p299_p8, %s2315_s7), 0  ;;  %s2857_s16 = smov 4  }
  0x1d   : > { %v380_v9 = vrot.slane %v322_v5, 7  ;;  %v381_v10 = vrot.slane %v323_v8, 7  ;;  %s306_s30 = scalar_select %p305_p9, 1, 0  ;;  %2382 = vmatpush3.msk.msra.mxu0 %vm1051_vm3, %v1006_v60 }
  0x1e   : > { %s2316_s8 = sshll.u32 %s4506_s7, 4  ;;  %s3010_s18 = sadd.s32 4, %s2944_s28 }
  0x1f   : > { %v2979_v11 = vsel %vm376_vm0, 0.0, %v380_v9  ;;  %v2982_v12 = vsel %vm376_vm0, %v380_v9, %v381_v10  ;;  %s302_s11 = scalar_lea.vmem %s2957_s9, %s2316_s8  ;;  %s307_s14 = scvt.s32.f32 %s306_s30  ;;  %v432_v35 = vsel %vm376_vm0, %v381_v10, 0.0 }
  0x20   : > { %682 = vrot.lane.b32.xlu0 %v2979_v11, %s2855_s10  ;;  %684 = vrot.lane.b32.xlu1 %v2982_v12, %s2855_s10  ;;  %v303_v13 = vld [vmem:[%s302_s11] sm:$0xff]  ;;  %v304_v14 = vld [vmem:[%s302_s11 + $0x8] sm:$0xff]  ;;  %v530_v33 = vrot.slane %v2979_v11, 1  ;;  %v531_v34 = vrot.slane %v2982_v12, 1  ;;  %v561_v37 = vrot.slane %v2979_v11, 2  ;;  %v562_v38 = vrot.slane %v2982_v12, 2  ;;  %s3021_s19 = scalar_lea.vmem %s2957_s9, %s2355_s13 }
  0x21   : > { %v308_v15 = vstv %s307_s14  ;;  %v533_v39 = vrot.slane %v432_v35, 1  ;;  %p335_p10 = scmp.lt.s32.totalorder %s3010_s18, 15  ;;  %s4443_s20 = smov 16   ;;  %v326_v42 = vld [vmem:[%s3021_s19] sm:$0xff]  ;;  %v327_v43 = vld [vmem:[%s3021_s19 + $0x8] sm:$0xff]  ;;  %v564_v45 = vrot.slane %v432_v35, 2 }
  0x22   : > { %v309_v16 = vmul.f32 %v308_v15, %v303_v13  ;;  %v310_v17 = vmul.f32 %v308_v15, %v304_v14  ;;  %v532_v36 = vsel %vm524_vm2, %v530_v33, %v531_v34  ;;  %v563_v40 = vsel %vm555_vm1, %v561_v37, %v562_v38  ;;  %s4448_s21 = smov 20   ;;  %v328_v4 = vld [vmem:[%s3021_s19 + $0x10] sm:$0xff]  ;;  %v329_v5 = vld [vmem:[%s3021_s19 + $0x18] sm:$0xff]  ;;  %s4466_s8 = smov 8  }
  0x23   : > { %v534_v41 = vsel %vm524_vm2, %v531_v34, %v533_v39  ;;  %s3029_s7 = scalar_select %p335_p10, %s3010_s18, 15  ;;  %v383_v44 = vrot.slane %v326_v42, 7  ;;  %v384_v46 = vrot.slane %v327_v43, 7  ;;  %v565_v48 = vsel %vm555_vm1, %v562_v38, %v564_v45  ;;  %v332_v42 = vld [vmem:[%s3021_s19 + $0x30] sm:$0xff]  ;;  %v333_v43 = vld [vmem:[%s3021_s19 + $0x38] sm:$0xff] }
  0x24   : > { %v377_v18 = vrot.slane %v309_v16, 7  ;;  %v378_v19 = vrot.slane %v310_v17, 7  ;;  %v386_v8 = vrot.slane %v328_v4, 7  ;;  %v387_v9 = vrot.slane %v329_v5, 7  ;;  %p341_p11 = scmp.lt.s32.totalorder %s3010_s18, 16  ;;  %p289_p0 = scmp.lt.s32.totalorder %s2944_s28, 15 }
  0x25   : > { %s4445_s13 = sshll.u32 %s3029_s7, 4  ;;  %v3043_v47 = vsel %vm376_vm0, 0.0, %v383_v44  ;;  %v3047_v49 = vsel %vm376_vm0, %v383_v44, %v384_v46  ;;  %v433_v59 = vsel %vm376_vm0, %v384_v46, 0.0  ;;  %v392_v45 = vrot.slane %v332_v42, 7  ;;  %s4467_s11 = sshll.u32 %s3029_s7, 4 }
  0x26   : > { %v2990_v20 = vsel %vm376_vm0, %v377_v18, %v378_v19  ;;  %v2993_v21 = vsel %vm376_vm0, 0.0, %v377_v18  ;;  %v431_v22 = vsel %vm376_vm0, %v378_v19, 0.0  ;;  %s3038_s30 = scalar_lea.vmem %s2962_s12, %s4445_s13  ;;  %s2860_s12 = smov 24   ;;  %v535_v53 = vrot.slane %v3043_v47, 1 }
  0x27   : > { %v556_v23 = vrot.slane %v2993_v21, 2  ;;  %v557_v24 = vrot.slane %v2990_v20, 2  ;;  %v525_v25 = vrot.slane %v2993_v21, 1  ;;  %v526_v26 = vrot.slane %v2990_v20, 1  ;;  %s2861_s13 = smov 28   ;;  %s338_s14 = scalar_lea.vmem %s2957_s9, %s4467_s11 }
  0x28   : > { %v559_v27 = vrot.slane %v431_v22, 2  ;;  %v528_v28 = vrot.slane %v431_v22, 1  ;;  %v536_v54 = vrot.slane %v3047_v49, 1  ;;  %v566_v61 = vrot.slane %v3043_v47, 2  ;;  %s3260_s7 = sadd.s32 5, %s2944_s28  ;;  %s4508_s28 = smov (!%p289_p0, %s2944_s28), 15 }
  0x29   : > { %v558_v29 = vsel %vm555_vm1, %v556_v23, %v557_v24  ;;  %v527_v30 = vsel %vm524_vm2, %v525_v25, %v526_v26  ;;  %v567_v62 = vrot.slane %v3047_v49, 2  ;;  %v538_v63 = vrot.slane %v433_v59, 1  ;;  %p348_p12 = scmp.lt.s32.totalorder %s3260_s7, 15  ;;  %p354_p13 = scmp.lt.s32.totalorder %s3260_s7, 16 }
  0x2a   : > { %646 = vrot.lane.b32.xlu1 %v558_v29, %s4446_s15  ;;  %610 = vrot.lane.b32.xlu0 %v527_v30, %s2857_s16  ;;  %v560_v31 = vsel %vm555_vm1, %v557_v24, %v559_v27  ;;  %v529_v32 = vsel %vm524_vm2, %v526_v26, %v528_v28  ;;  %v537_v57 = vsel %vm524_vm2, %v535_v53, %v536_v54  ;;  %v569_v2 = vrot.slane %v433_v59, 2  ;;  %v330_v27 = vld [vmem:[%s3021_s19 + $0x20] sm:$0xff]  ;;  %v331_v28 = vld [vmem:[%s3021_s19 + $0x28] sm:$0xff]  ;;  %s342_s19 = scalar_select %p341_p11, 1, 0 }
  0x2b   : > { %v568_v0 = vsel %vm555_vm1, %v566_v61, %v567_v62  ;;  %v539_v1 = vsel %vm524_vm2, %v536_v54, %v538_v63  ;;  %v3096_v10 = vsel %vm376_vm0, 0.0, %v386_v8  ;;  %v3099_v13 = vsel %vm376_vm0, %v386_v8, %v387_v9 }
  0x2c   : > { %v570_v3 = vsel %vm555_vm1, %v567_v62, %v569_v2  ;;  %v540_v14 = vrot.slane %v3096_v10, 1  ;;  %v541_v15 = vrot.slane %v3099_v13, 1  ;;  %v434_v17 = vsel %vm376_vm0, %v387_v9, 0.0  ;;  %s343_s18 = scvt.s32.f32 %s342_s19 }
  0x2d   : > { %v571_v18 = vrot.slane %v3096_v10, 2  ;;  %v572_v19 = vrot.slane %v3099_v13, 2  ;;  %v543_v22 = vrot.slane %v434_v17, 1  ;;  %v574_v25 = vrot.slane %v434_v17, 2  ;;  %s349_s19 = scalar_select %p348_p12, %s3260_s7, 15 }
  0x2e   : > { %648 = vrot.lane.b32.xlu1 %v560_v31, %s4446_s15  ;;  %612 = vrot.lane.b32.xlu0 %v529_v32, %s2857_s16  ;;  %v542_v16 = vsel %vm524_vm2, %v540_v14, %v541_v15  ;;  %v389_v29 = vrot.slane %v330_v27, 7  ;;  %v390_v30 = vrot.slane %v331_v28, 7  ;;  %v393_v46 = vrot.slane %v333_v43, 7 }
  0x2f   : > { %v573_v23 = vsel %vm555_vm1, %v571_v18, %v572_v19  ;;  %v544_v24 = vsel %vm524_vm2, %v541_v15, %v543_v22  ;;  %v575_v26 = vsel %vm555_vm1, %v572_v19, %v574_v25  ;;  %v3169_v51 = vsel %vm376_vm0, 0.0, %v392_v45  ;;  %v339_v15 = vld [vmem:[%s338_s14] sm:$0xff]  ;;  %s2321_s11 = sshll.u32 %s349_s19, 4  ;;  %s2868_s19 = smov 104  }
  0x30   : > { %v3133_v31 = vsel %vm376_vm0, 0.0, %v389_v29  ;;  %v3136_v32 = vsel %vm376_vm0, %v389_v29, %v390_v30  ;;  %v3166_v50 = vsel %vm376_vm0, %v392_v45, %v393_v46  ;;  %v436_v52 = vsel %vm376_vm0, %v393_v46, 0.0  ;;  %s351_s7 = scalar_lea.vmem %s2957_s9, %s2321_s11  ;;  %s2863_s9 = smov 72  }
  0x31   : > { %v545_v33 = vrot.slane %v3133_v31, 1  ;;  %v546_v34 = vrot.slane %v3136_v32, 1  ;;  %v576_v37 = vrot.slane %v3133_v31, 2  ;;  %v577_v38 = vrot.slane %v3136_v32, 2 }
  0x32   : > { %614 = vrot.lane.b32.xlu1 %v532_v36, %s2857_s16  ;;  %718 = vrot.lane.b32.xlu0 %v532_v36, %s4443_s20  ;;  %v435_v36 = vsel %vm376_vm0, %v390_v30, 0.0  ;;  %v551_v55 = vrot.slane %v3166_v50, 1  ;;  %v553_v56 = vrot.slane %v436_v52, 1  ;;  %v581_v60 = vrot.slane %v3169_v51, 2 }
  0x33   : > { %v547_v35 = vsel %vm524_vm2, %v545_v33, %v546_v34  ;;  %v548_v39 = vrot.slane %v435_v36, 1  ;;  %v579_v44 = vrot.slane %v435_v36, 2  ;;  %v582_v61 = vrot.slane %v3166_v50, 2 }
  0x34   : > { %v3185_v58 = vsel %vm524_vm2, %v551_v55, %v553_v56  ;;  %v3220_v17 = vstv %s343_s18  ;;  %s355_s18 = scalar_select %p354_p13, 1, 0 }
  0x35   : > { %v345_v22 = vmul.f32 %v3220_v17, %v339_v15 }
  0x36   : > { %754 = vrot.lane.b32.xlu1 %v563_v40, %s4448_s21  ;;  %720 = vrot.lane.b32.xlu0 %v534_v41, %s4443_s20  ;;  %s4464_s20 = smov 16  }
  0x3a   : > { %650 = vrot.lane.b32.xlu1 %v563_v40, %s4446_s15  ;;  %616 = vrot.lane.b32.xlu0 %v534_v41, %s2857_s16  ;;  %v578_v40 = vsel %vm555_vm1, %v576_v37, %v577_v38  ;;  %v549_v41 = vsel %vm524_vm2, %v546_v34, %v548_v39 }
  0x3e   : > { %790 = vrot.lane.b32.xlu1 %v3043_v47, %s2860_s12  ;;  %756 = vrot.lane.b32.xlu0 %v565_v48, %s4448_s21  ;;  %s4465_s21 = smov 20  }
  0x42   : > { %686 = vrot.lane.b32.xlu1 %v3043_v47, %s2855_s10  ;;  %652 = vrot.lane.b32.xlu0 %v565_v48, %s4446_s15  ;;  %s2862_s15 = smov 32   ;;  %v580_v48 = vsel %vm555_vm1, %v577_v38, %v579_v44 }
  0x46   : > { %826 = vrot.lane.b32.xlu1 %v537_v57, %s2861_s13  ;;  %792 = vrot.lane.b32.xlu0 %v3047_v49, %s2860_s12 }
  0x4a   : > { %722 = vrot.lane.b32.xlu1 %v537_v57, %s4464_s20  ;;  %688 = vrot.lane.b32.xlu0 %v3047_v49, %s2855_s10 }
  0x4e   : > { %862 = vrot.lane.b32.xlu1 %v568_v0, %s2862_s15  ;;  %828 = vrot.lane.b32.xlu0 %v539_v1, %s2861_s13 }
  0x52   : > { %724 = vrot.lane.b32.xlu1 %v539_v1, %s4464_s20  ;;  %618 = vrot.lane.b32.xlu0 %v537_v57, %s2857_s16  ;;  %v550_v57 = vrot.slane %v3169_v51, 1 }
  0x54   : > { %v3188_v59 = vsel %vm524_vm2, %v550_v57, %v551_v55 }
  0x56   : > { %864 = vrot.lane.b32.xlu1 %v570_v3, %s2862_s15  ;;  %758 = vrot.lane.b32.xlu0 %v568_v0, %s4465_s21 }
  0x5a   : > { %654 = vrot.lane.b32.xlu1 %v568_v0, %s4466_s8  ;;  %620 = vrot.lane.b32.xlu0 %v539_v1, %s2857_s16  ;;  %v3198_v0 = vsel %vm555_vm1, %v581_v60, %v582_v61  ;;  %v584_v1 = vrot.slane %v436_v52, 2 }
  0x5c   : > { %v3208_v4 = vsel %vm555_vm1, %v582_v61, %v584_v1 }
  0x5e   : > { %794 = vrot.lane.b32.xlu1 %v3096_v10, %s2860_s12  ;;  %760 = vrot.lane.b32.xlu0 %v570_v3, %s4465_s21 }
  0x62   : > { %690 = vrot.lane.b32.xlu1 %v3096_v10, %s2855_s10  ;;  %656 = vrot.lane.b32.xlu0 %v570_v3, %s4466_s8 }
  0x66   : > { %830 = vrot.lane.b32.xlu1 %v542_v16, %s2861_s13  ;;  %796 = vrot.lane.b32.xlu0 %v3099_v13, %s2860_s12 }
  0x6a   : > { %726 = vrot.lane.b32.xlu1 %v542_v16, %s4464_s20  ;;  %692 = vrot.lane.b32.xlu0 %v3099_v13, %s2855_s10 }
  0x6e   : > { %866 = vrot.lane.b32.xlu1 %v573_v23, %s2862_s15  ;;  %832 = vrot.lane.b32.xlu0 %v544_v24, %s2861_s13 }
  0x72   : > { %728 = vrot.lane.b32.xlu1 %v544_v24, %s4464_s20  ;;  %622 = vrot.lane.b32.xlu0 %v542_v16, %s2857_s16  ;;  %v340_v16 = vld [vmem:[%s338_s14 + $0x8] sm:$0xff]  ;;  %s356_s14 = scvt.s32.f32 %s355_s18  ;;  %s2869_s18 = smov 112  }
  0x76   : > { %868 = vrot.lane.b32.xlu1 %v575_v26, %s2862_s15  ;;  %762 = vrot.lane.b32.xlu0 %v573_v23, %s4465_s21 }
  0x7a   : > { %658 = vrot.lane.b32.xlu1 %v573_v23, %s4466_s8  ;;  %624 = vrot.lane.b32.xlu0 %v544_v24, %s2857_s16  ;;  %v346_v23 = vmul.f32 %v3220_v17, %v340_v16 }
  0x7c   : > { %v396_v27 = vrot.slane %v346_v23, 7 }
  0x7e   : > { %798 = vrot.lane.b32.xlu1 %v3133_v31, %s2860_s12  ;;  %764 = vrot.lane.b32.xlu0 %v575_v26, %s4465_s21  ;;  %v437_v34 = vsel %vm376_vm0, %v396_v27, 0.0 }
  0x7f   : > { %v591_v37 = vrot.slane %v437_v34, 1  ;;  %v596_v60 = vrot.slane %v437_v34, 2 }
  0x82   : > { %694 = vrot.lane.b32.xlu1 %v3133_v31, %s2855_s10  ;;  %660 = vrot.lane.b32.xlu0 %v575_v26, %s4466_s8  ;;  %v395_v26 = vrot.slane %v345_v22, 7 }
  0x84   : > { %v3245_v30 = vsel %vm376_vm0, %v395_v26, %v396_v27  ;;  %v3248_v33 = vsel %vm376_vm0, 0.0, %v395_v26  ;;  %v352_v26 = vld [vmem:[%s351_s7] sm:$0xff]  ;;  %v357_v27 = vstv %s356_s14 }
  0x85   : > { %v589_v36 = vrot.slane %v3245_v30, 1  ;;  %v588_v38 = vrot.slane %v3248_v33, 1  ;;  %v593_v43 = vrot.slane %v3248_v33, 2  ;;  %v594_v44 = vrot.slane %v3245_v30, 2 }
  0x86   : > { %834 = vrot.lane.b32.xlu1 %v547_v35, %s2861_s13  ;;  %800 = vrot.lane.b32.xlu0 %v3136_v32, %s2860_s12  ;;  %v358_v34 = vmul.f32 %v357_v27, %v352_v26 }
  0x87   : > { %v590_v42 = vsel %vm524_vm2, %v588_v38, %v589_v36  ;;  %v595_v57 = vsel %vm555_vm1, %v593_v43, %v594_v44  ;;  %v470_v38 = vrot.slane %v2974_v6, 7  ;;  %v445_v6 = vld [vmem:[%s2969_s17] sm:$0xff] }
  0x8a   : > { %730 = vrot.lane.b32.xlu1 %v547_v35, %s4464_s20  ;;  %696 = vrot.lane.b32.xlu0 %v3136_v32, %s2855_s10 }
  0x8e   : > { %870 = vrot.lane.b32.xlu1 %v578_v40, %s2862_s15  ;;  %836 = vrot.lane.b32.xlu0 %v549_v41, %s2861_s13 }
  0x92   : > { %766 = vrot.lane.b32.xlu1 %v578_v40, %s4465_s21  ;;  %732 = vrot.lane.b32.xlu0 %v549_v41, %s4464_s20  ;;  %v3174_v53 = vpop.permute.xlu0 %682  ;;  %v3176_v54 = vpop.permute.xlu1 %684 }
  0x96   : > { %768 = vrot.lane.b32.xlu1 %v580_v48, %s4465_s21  ;;  %872 = vrot.lane.b32.xlu0 %v580_v48, %s2862_s15 }
  0x9a   : > { %804 = vrot.lane.b32.xlu1 %v3166_v50, %s2860_s12  ;;  %802 = vrot.lane.b32.xlu0 %v3169_v51, %s2860_s12 }
  0x9c   : > { %v647_v62 = vpop.permute.xlu1 %646  ;;  %v611_v63 = vpop.permute.xlu0 %610 }
  0x9e   : > { %840 = vrot.lane.b32.xlu1 %v3185_v58, %s2861_s13  ;;  %838 = vrot.lane.b32.xlu0 %v3188_v59, %s2861_s13 }
  0xa0   : > { %v3200_v2 = vpop.permute.xlu1 %648  ;;  %v3202_v3 = vpop.permute.xlu0 %612 }
  0xa1   : > { %v900_v55 = vsel %vm898_vm4, %v2990_v20, %v3202_v3  ;;  %v597_v3 = vsel %vm555_vm1, %v594_v44, %v596_v60 }
  0xa2   : > { %626 = vrot.lane.b32.xlu1 %v547_v35, %s2857_s16  ;;  %874 = vrot.lane.b32.xlu0 %v3198_v0, %s2862_s15  ;;  %v899_v35 = vsel %vm898_vm4, %v2993_v21, %v611_v63  ;;  %v592_v21 = vsel %vm524_vm2, %v589_v36, %v591_v37  ;;  %v913_v20 = vsel %vm911_vm5, %v900_v55, %v3200_v2 }
  0xa4   : > { %v3210_v5 = vpop.permute.xlu1 %614  ;;  %v719_v8 = vpop.permute.xlu0 %718 }
  0xa6   : > { %628 = vrot.lane.b32.xlu1 %v549_v41, %s2857_s16  ;;  %876 = vrot.lane.b32.xlu0 %v3208_v4, %s2862_s15  ;;  %v912_v41 = vsel %vm911_vm5, %v899_v35, %v647_v62 }
  0xa7   : > { %v925_v45 = vsel %vm924_vm6, %v912_v41, %v3174_v53 }
  0xa8   : > { %v755_v9 = vpop.permute.xlu1 %754  ;;  %v3218_v14 = vpop.permute.xlu0 %720  ;;  %v938_v52 = vsel %vm937_vm7, %v925_v45, %v719_v8  ;;  %v926_v8 = vsel %vm924_vm6, %v913_v20, %v3176_v54  ;;  %v446_v45 = vld [vmem:[%s2969_s17 + $0x8] sm:$0xff] }
  0xa9   : > { %v951_v56 = vsel %vm950_vm8, %v938_v52, %v755_v9  ;;  %v939_v15 = vsel %vm937_vm7, %v926_v8, %v3218_v14  ;;  %v353_v14 = vld [vmem:[%s351_s7 + $0x8] sm:$0xff]  ;;  %v474_v60 = vrot.slane %v446_v45, 7  ;;  %v448_v45 = vld [vmem:[%s2969_s17 + $0x18] sm:$0xff] }
  0xaa   : > { %664 = vrot.lane.b32.xlu1 %v580_v48, %s4466_s8  ;;  %662 = vrot.lane.b32.xlu0 %v578_v40, %s4466_s8  ;;  %v359_v35 = vmul.f32 %v357_v27, %v353_v14 }
  0xac   : > { %v3224_v18 = vpop.permute.xlu1 %650  ;;  %v3226_v19 = vpop.permute.xlu0 %616 }
  0xae   : > { %700 = vrot.lane.b32.xlu1 %v3166_v50, %s2855_s10  ;;  %698 = vrot.lane.b32.xlu0 %v3169_v51, %s2855_s10 }
  0xb0   : > { %v791_v24 = vpop.permute.xlu1 %790  ;;  %v3234_v25 = vpop.permute.xlu0 %756 }
  0xb1   : > { %v964_v53 = vsel %vm963_vm9, %v951_v56, %v791_v24 }
  0xb2   : > { %736 = vrot.lane.b32.xlu1 %v3185_v58, %s4464_s20  ;;  %734 = vrot.lane.b32.xlu0 %v3188_v59, %s4464_s20 }
  0xb4   : > { %v3240_v28 = vpop.permute.xlu1 %686  ;;  %v3242_v29 = vpop.permute.xlu0 %652 }
  0xb6   : > { %772 = vrot.lane.b32.xlu1 %v3208_v4, %s4465_s21  ;;  %770 = vrot.lane.b32.xlu0 %v3198_v0, %s4465_s21 }
  0xb8   : > { %v827_v39 = vpop.permute.xlu1 %826  ;;  %v793_v40 = vpop.permute.xlu0 %792 }
  0xb9   : > { %v977_v61 = vsel %vm976_vm10, %v964_v53, %v827_v39  ;;  %v471_v39 = vrot.slane %v2976_v7, 7  ;;  %v473_v53 = vrot.slane %v445_v6, 7  ;;  %v447_v6 = vld [vmem:[%s2969_s17 + $0x10] sm:$0xff] }
  0xba   : > { %808 = vrot.lane.b32.xlu1 %v3245_v30, %s2860_s12  ;;  %806 = vrot.lane.b32.xlu0 %v3248_v33, %s2860_s12 }
  0xbb   : > { %v3352_v52 = vsel %vm376_vm0, %v470_v38, %v471_v39 }
  0xbc   : > { %v3274_v46 = vpop.permute.xlu1 %722  ;;  %v3276_v48 = vpop.permute.xlu0 %688 }
  0xbe   : > { %844 = vrot.lane.b32.xlu1 %v592_v21, %s2861_s13  ;;  %842 = vrot.lane.b32.xlu0 %v590_v42, %s2861_s13 }
  0xc0   : > { %v863_v62 = vpop.permute.xlu1 %862  ;;  %v829_v63 = vpop.permute.xlu0 %828 }
  0xc1   : > { %v990_v1 = vsel %vm989_vm11, %v977_v61, %v863_v62 }
  0xc2   : > { %630 = vrot.lane.b32.xlu1 %v3188_v59, %s2857_s16  ;;  %878 = vrot.lane.b32.xlu0 %v595_v57, %s2862_s15  ;;  %v952_v59 = vsel %vm950_vm8, %v939_v15, %v3234_v25  ;;  %v449_v15 = vld [vmem:[%s2969_s17 + $0x20] sm:$0xff] }
  0xc3   : > { %2383 = vmatprep.mubr.msk.f32.mxu0 %vm1014_vm12, %v990_v1  ;;  %v965_v16 = vsel %vm963_vm9, %v952_v59, %v793_v40  ;;  %v3364_v1 = vsel %vm376_vm0, 0.0, %v470_v38  ;;  %v1423_v38 = vrot.slane %v3352_v52, 2 }
  0xc4   : > { %v3304_v9 = vpop.permute.xlu1 %724  ;;  %v3306_v2 = vpop.permute.xlu0 %618  ;;  %v978_v54 = vsel %vm976_vm10, %v965_v16, %v829_v63  ;;  %v1422_v14 = vrot.slane %v3364_v1, 2 }
  0xc6   : > { %632 = vrot.lane.b32.xlu1 %v3185_v58, %s2857_s16  ;;  %880 = vrot.lane.b32.xlu0 %v597_v3, %s2862_s15  ;;  %s2865_s16 = smov 120  }
  0xc8   : > { %v865_v22 = vpop.permute.xlu1 %864  ;;  %v759_v23 = vpop.permute.xlu0 %758 }
  0xc9   : > { %v991_v24 = vsel %vm989_vm11, %v978_v54, %v865_v22  ;;  %v3381_v54 = vsel %vm376_vm0, %v473_v53, %v474_v60  ;;  %v3385_v22 = vld [vmem:[%s2969_s17 + $0x28] sm:$0xff] }
  0xca   : > { %668 = vrot.lane.b32.xlu1 %v3208_v4, %s4466_s8  ;;  %666 = vrot.lane.b32.xlu0 %v3198_v0, %s4466_s8  ;;  %v398_v4 = vrot.slane %v358_v34, 7  ;;  %v399_v0 = vrot.slane %v359_v35, 7  ;;  %v479_v35 = vrot.slane %v449_v15, 7  ;;  %v477_v15 = vrot.slane %v448_v45, 7 }
  0xcb   : > { %2384 = vmatmul.mubr.msk.f32.vlgmr.msra.gmra.mrb[0].mxu0 %vm1014_vm12, %v991_v24 }
  0xcc   : > { %v3324_v58 = vpop.permute.xlu1 %654  ;;  %v3326_v25 = vpop.permute.xlu0 %620  ;;  %v430_v41 = vsel %vm376_vm0, 0.0, %v398_v4  ;;  %v438_v43 = vsel %vm376_vm0, %v399_v0, 0.0 }
  0xcd   : > { %v603_v44 = vrot.slane %v438_v43, 1  ;;  %v608_v62 = vrot.slane %v438_v43, 2  ;;  %v605_v20 = vrot.slane %v430_v41, 2 }
  0xce   : > { %704 = vrot.lane.b32.xlu1 %v3245_v30, %s2855_s10  ;;  %702 = vrot.lane.b32.xlu0 %v3248_v33, %s2855_s10  ;;  %v400_v33 = vsel %vm376_vm0, %v398_v4, %v399_v0  ;;  %v1408_v4 = vrot.slane %v3381_v54, 1  ;;  %v480_v0 = vrot.slane %v3385_v22, 7  ;;  %s2864_s10 = smov 80  }
  0xcf   : > { %v606_v61 = vrot.slane %v400_v33, 2 }
  0xd0   : > { %v795_v36 = vpop.permute.xlu1 %794  ;;  %v3332_v37 = vpop.permute.xlu0 %760 }
  0xd1   : > { %v609_v26 = vsel %vm555_vm1, %v606_v61, %v608_v62 }
  0xd2   : > { %740 = vrot.lane.b32.xlu1 %v592_v21, %s4464_s20  ;;  %738 = vrot.lane.b32.xlu0 %v590_v42, %s4464_s20  ;;  %v601_v21 = vrot.slane %v400_v33, 1  ;;  %v600_v42 = vrot.slane %v430_v41, 1 }
  0xd4   : > { %v3338_v40 = vpop.permute.xlu1 %690  ;;  %v3340_v30 = vpop.permute.xlu0 %656  ;;  %v604_v8 = vsel %vm524_vm2, %v601_v21, %v603_v44 }
  0xd6   : > { %776 = vrot.lane.b32.xlu1 %v597_v3, %s4465_s21  ;;  %774 = vrot.lane.b32.xlu0 %v595_v57, %s4465_s21  ;;  %v901_v57 = vsel %vm898_vm4, %v2979_v11, %v3210_v5  ;;  %v602_v11 = vsel %vm524_vm2, %v600_v42, %v601_v21  ;;  %v3371_v5 = vsel %vm376_vm0, 0.0, %v473_v53  ;;  %v3403_v21 = vsel %vm376_vm0, 0.0, %v479_v35  ;;  %s2867_s21 = smov 96  }
  0xd7   : > { %v914_v63 = vsel %vm911_vm5, %v901_v57, %v3224_v18  ;;  %v1407_v34 = vrot.slane %v3371_v5, 1  ;;  %v3413_v53 = vsel %vm376_vm0, %v479_v35, %v480_v0  ;;  %v1428_v57 = vrot.slane %v3381_v54, 2 }
  0xd8   : > { %v831_v55 = vpop.permute.xlu1 %830  ;;  %v3354_v56 = vpop.permute.xlu0 %796  ;;  %v927_v3 = vsel %vm924_vm6, %v914_v63, %v3240_v28  ;;  %v507_v28 = vsel %vm376_vm0, %v474_v60, 0.0  ;;  %v1438_v60 = vrot.slane %v3413_v53, 2 }
  0xd9   : > { %v940_v18 = vsel %vm937_vm7, %v927_v3, %v3274_v46  ;;  %v607_v46 = vsel %vm555_vm1, %v605_v20, %v606_v61  ;;  %v3430_v61 = vsel %vm524_vm2, %v1407_v34, %v1408_v4  ;;  %v1430_v63 = vrot.slane %v507_v28, 2 }
  0xda   : > { %812 = vrot.lane.b32.xlu1 %v400_v33, %s2860_s12  ;;  %810 = vrot.lane.b32.xlu0 %v430_v41, %s2860_s12  ;;  %v953_v24 = vsel %vm950_vm8, %v940_v18, %v759_v23  ;;  %v1410_v23 = vrot.slane %v507_v28, 1 }
  0xdb   : > { %v966_v27 = vsel %vm963_vm9, %v953_v24, %v795_v36  ;;  %v902_v36 = vsel %vm898_vm4, %v2982_v12, %v3226_v19  ;;  %v3418_v12 = vsel %vm555_vm1, %v1422_v14, %v1423_v38  ;;  %v1427_v19 = vrot.slane %v3371_v5, 2 }
  0xdc   : > { %v3376_v59 = vpop.permute.xlu1 %726  ;;  %v3378_v16 = vpop.permute.xlu0 %692  ;;  %v979_v33 = vsel %vm976_vm10, %v966_v27, %v831_v55  ;;  %v915_v42 = vsel %vm911_vm5, %v902_v36, %v3242_v29  ;;  %v2515_v29 = vpack.i.bf16 %v3381_v54, %v3371_v5  ;;  %v1437_v55 = vrot.slane %v3403_v21, 2 }
  0xdd   : > { %v3433_v62 = vsel %vm524_vm2, %v1408_v4, %v1410_v23  ;;  %v928_v20 = vsel %vm924_vm6, %v915_v42, %v3276_v48  ;;  %v3458_v14 = vsel %vm555_vm1, %v1427_v19, %v1428_v57 }
  0xde   : > { %848 = vrot.lane.b32.xlu1 %v604_v8, %s2861_s13  ;;  %846 = vrot.lane.b32.xlu0 %v602_v11, %s2861_s13  ;;  %v476_v11 = vrot.slane %v447_v6, 7  ;;  %v3444_v18 = vsel %vm555_vm1, %v1437_v55, %v1438_v60  ;;  %v941_v24 = vsel %vm937_vm7, %v928_v20, %v3304_v9  ;;  %v2520_v48 = vpack.i.bf16 %v3433_v62, %v3430_v61  ;;  %s2866_s13 = smov 88  }
  0xdf   : > { %v954_v28 = vsel %vm950_vm8, %v941_v24, %v3332_v37  ;;  %v3461_v9 = vsel %vm555_vm1, %v1428_v57, %v1430_v63  ;;  %v3465_v37 = vpack.i.bf16 %v3413_v53, %v3403_v21  ;;  %v903_v24 = vsel %vm898_vm4, %v3043_v47, %v3306_v2 }
  0xe0   : > { %v867_v41 = vpop.permute.xlu1 %866  ;;  %v833_v43 = vpop.permute.xlu0 %832  ;;  %v3469_v35 = vsel %vm376_vm0, %v476_v11, %v477_v15  ;;  %v3472_v4 = vsel %vm376_vm0, 0.0, %v476_v11  ;;  %v2525_v36 = vpack.i.bf16 %v3461_v9, %v3458_v14  ;;  %v904_v2 = vsel %vm898_vm4, %v3047_v49, %v3326_v25 }
  0xe1   : > { %v992_v44 = vsel %vm989_vm11, %v979_v33, %v867_v41  ;;  %v1412_v33 = vrot.slane %v3472_v4, 1  ;;  %v1413_v41 = vrot.slane %v3469_v35, 1  ;;  %v3490_v6 = vpack.i.bf16 %v3469_v35, %v3472_v4 }
  0xe2   : > { %884 = vrot.lane.b32.xlu1 %v609_v26, %s2862_s15  ;;  %882 = vrot.lane.b32.xlu0 %v607_v46, %s2862_s15  ;;  %v967_v26 = vsel %vm963_vm9, %v954_v28, %v3354_v56  ;;  %v3475_v56 = vsel %vm376_vm0, %v477_v15, 0.0  ;;  %v916_v28 = vsel %vm911_vm5, %v903_v24, %v3324_v58  ;;  %v917_v58 = vsel %vm911_vm5, %v904_v2, %v3340_v30 }
  0xe3   : > { %2386 = vmatprep.mubr.msk.f32.mxu0 %vm1014_vm12, %v992_v44  ;;  %v980_v27 = vsel %vm976_vm10, %v967_v26, %v833_v43  ;;  %v1415_v43 = vrot.slane %v3475_v56, 1  ;;  %v3493_v45 = vsel %vm524_vm2, %v1412_v33, %v1413_v41 }
  0xe4   : > { %v3437_v3 = vpop.permute.xlu1 %728  ;;  %v3439_v8 = vpop.permute.xlu0 %622 }
  0xe5   : > { %v3496_v19 = vsel %vm524_vm2, %v1413_v41, %v1415_v43 }
  0xe6   : > { %2516 = vrot.lane.b32.xlu1 %v2515_v29, %s2863_s9  ;;  %1969 = vrot.lane.b32.xlu0 %v3444_v18, %s4466_s8  ;;  %4468 = vst [vmem:[#allocation2_spill] sm:$0xff] %v3496_v19  ;;  %v3502_v57 = vpack.i.bf16 %v3496_v19, %v3493_v45 }
  0xe8   : > { %v869_v46 = vpop.permute.xlu1 %868  ;;  %v763_v34 = vpop.permute.xlu0 %762 }
  0xe9   : > { %v993_v23 = vsel %vm989_vm11, %v980_v27, %v869_v46 }
  0xea   : > { %2387 = vmatmul.mubr.msk.f32.gmra.mrb[2].mxu0 %vm1014_vm12, %v993_v23  ;;  %2521 = vrot.lane.b32.xlu1 %v2520_v48, %s2864_s10  ;;  %v929_v48 = vsel %vm924_vm6, %v916_v28, %v3338_v40  ;;  %v930_v40 = vsel %vm924_vm6, %v917_v58, %v3378_v16  ;;  %v905_v16 = vsel %vm898_vm4, %v3096_v10, %v3439_v8 }
  0xeb   : > { %2546 = vrot.lane.b32.xlu0 %v3465_v37, %s2865_s16  ;;  %v942_v46 = vsel %vm937_vm7, %v929_v48, %v3376_v59 }
  0xec   : > { %v659_v42 = vpop.permute.xlu1 %658  ;;  %v625_v44 = vpop.permute.xlu0 %624  ;;  %v955_v23 = vsel %vm950_vm8, %v942_v46, %v763_v34 }
  0xee   : > { %2526 = vrot.lane.b32.xlu1 %v2525_v36, %s2866_s13 }
  0xf0   : > { %v799_v29 = vpop.permute.xlu1 %798  ;;  %v765_v55 = vpop.permute.xlu0 %764 }
  0xf1   : > { %v968_v36 = vsel %vm963_vm9, %v955_v23, %v799_v29  ;;  %v943_v29 = vsel %vm937_vm7, %v930_v40, %v3437_v3  ;;  %v918_v3 = vsel %vm911_vm5, %v905_v16, %v659_v42 }
  0xf2   : > { %2531 = vrot.lane.b32.xlu1 %v3490_v6, %s2867_s21 }
  0xf4   : > { %v695_v63 = vpop.permute.xlu1 %694  ;;  %v661_v20 = vpop.permute.xlu0 %660 }
  0xf6   : > { %2536 = vrot.lane.b32.xlu1 %v3502_v57, %s2868_s19 }
  0xf8   : > { %v835_v11 = vpop.permute.xlu1 %834  ;;  %v801_v15 = vpop.permute.xlu0 %800 }
  0xf9   : > { %v981_v33 = vsel %vm976_vm10, %v968_v36, %v835_v11  ;;  %v956_v11 = vsel %vm950_vm8, %v943_v29, %v765_v55  ;;  %v931_v55 = vsel %vm924_vm6, %v918_v3, %v695_v63  ;;  %v1435_v29 = vrot.slane %v3475_v56, 2 }
  0xfa   : > { %v969_v24 = vsel %vm963_vm9, %v956_v11, %v801_v15  ;;  %v509_v11 = vsel %vm376_vm0, %v480_v0, 0.0 }
  0xfb   : > { %v1420_v3 = vrot.slane %v509_v11, 1 }
  0xfc   : > { %v731_v26 = vpop.permute.xlu1 %730  ;;  %v697_v27 = vpop.permute.xlu0 %696 }
  0xfd   : > { %v944_v36 = vsel %vm937_vm7, %v931_v55, %v731_v26  ;;  %v1418_v55 = vrot.slane %v3413_v53, 1 }
 0x100   : > { %v871_v41 = vpop.permute.xlu1 %870  ;;  %v837_v43 = vpop.permute.xlu0 %836 }
 0x101   : > { %v994_v47 = vsel %vm989_vm11, %v981_v33, %v871_v41  ;;  %v982_v28 = vsel %vm976_vm10, %v969_v24, %v837_v43  ;;  %v906_v33 = vsel %vm898_vm4, %v3099_v13, %v625_v44 }
 0x102   : > { %2389 = vmatprep.mubr.msk.f32.mxu0 %vm1014_vm12, %v994_v47  ;;  %v919_v43 = vsel %vm911_vm5, %v906_v33, %v661_v20  ;;  %v451_v33 = vld [vmem:[%s2969_s17 + $0x30] sm:$0xff] }
 0x103   : > { %v932_v2 = vsel %vm924_vm6, %v919_v43, %v697_v27 }
 0x104   : > { %v767_v59 = vpop.permute.xlu1 %766  ;;  %v733_v34 = vpop.permute.xlu0 %732 }
 0x105   : > { %v957_v41 = vsel %vm950_vm8, %v944_v36, %v767_v59  ;;  %v945_v63 = vsel %vm937_vm7, %v932_v2, %v733_v34  ;;  %v1432_v59 = vrot.slane %v3472_v4, 2  ;;  %v1433_v34 = vrot.slane %v3469_v35, 2 }
 0x106   : > { %v482_v2 = vrot.slane %v451_v33, 7 }
 0x108   : > { %v769_v49 = vpop.permute.xlu1 %768  ;;  %v873_v25 = vpop.permute.xlu0 %872 }
 0x109   : > { %v995_v48 = vsel %vm989_vm11, %v982_v28, %v873_v25  ;;  %v958_v26 = vsel %vm950_vm8, %v945_v63, %v769_v49  ;;  %v3564_v49 = vsel %vm555_vm1, %v1432_v59, %v1433_v34  ;;  %v3567_v25 = vsel %vm555_vm1, %v1433_v34, %v1435_v29 }
 0x10a   : > { %2390 = vmatmul.mubr.msk.f32.gmra.mrb[4].mxu0 %vm1014_vm12, %v995_v48  ;;  %v1440_v48 = vrot.slane %v509_v11, 2  ;;  %v1403_v63 = vrot.slane %v3352_v52, 1 }
 0x10c   : > { %v805_v30 = vpop.permute.xlu1 %804  ;;  %v803_v46 = vpop.permute.xlu0 %802  ;;  %v3574_v56 = vsel %vm555_vm1, %v1438_v60, %v1440_v48  ;;  %v1417_v60 = vrot.slane %v3403_v21, 1 }
 0x10d   : > { %v970_v47 = vsel %vm963_vm9, %v957_v41, %v803_v46  ;;  %v971_v13 = vsel %vm963_vm9, %v958_v26, %v805_v30  ;;  %v2540_v30 = vpack.i.bf16 %v3567_v25, %v3564_v49  ;;  %1971 = vrot.lane.b32.xlu0 %v3574_v56, %s4466_s8  ;;  %v452_v41 = vld [vmem:[%s2969_s17 + $0x38] sm:$0xff]  ;;  %v2575_v43 = vpack.i.bf16 %v3574_v56, %v3444_v18  ;;  %s2873_s17 = smov 48  }
 0x10e   : > { %v3589_v36 = vsel %vm524_vm2, %v1417_v60, %v1418_v55 }
 0x10f   : > { %2541 = vrot.lane.b32.xlu1 %v2540_v30, %s2869_s18 }
 0x110   : > { %v841_v23 = vpop.permute.xlu1 %840  ;;  %v839_v15 = vpop.permute.xlu0 %838 }
 0x111   : > { %v983_v10 = vsel %vm976_vm10, %v970_v47, %v839_v15  ;;  %v984_v44 = vsel %vm976_vm10, %v971_v13, %v841_v23  ;;  %2561 = vrot.lane.b32.xlu0 %v2540_v30, %s2866_s13  ;;  %v3601_v47 = vsel %vm376_vm0, %v471_v39, 0.0  ;;  %v504_v13 = vsel %vm376_vm0, 0.0, %v482_v2 }
 0x113   : > { %2551 = vrot.lane.b32.xlu1 %v3490_v6, %s2863_s9  ;;  %v3592_v6 = vsel %vm524_vm2, %v1418_v55, %v1420_v3 }
 0x114   : > { %v627_v8 = vpop.permute.xlu1 %626  ;;  %v875_v42 = vpop.permute.xlu0 %874 }
 0x115   : > { %v996_v58 = vsel %vm989_vm11, %v983_v10, %v875_v42  ;;  %2566 = vrot.lane.b32.xlu0 %v3465_v37, %s2867_s21  ;;  %v2570_v37 = vpack.i.bf16 %v3592_v6, %v3589_v36  ;;  %v483_v10 = vrot.slane %v452_v41, 7  ;;  %v1402_v42 = vrot.slane %v3364_v1, 1 }
 0x116   : > { %2392 = vmatprep.mubr.msk.f32.mxu0 %vm1014_vm12, %v996_v58 }
 0x117   : > { %2556 = vrot.lane.b32.xlu1 %v3502_v57, %s2864_s10  ;;  %v1425_v57 = vrot.slane %v3601_v47, 2  ;;  %v3616_v39 = vsel %vm376_vm0, %v482_v2, %v483_v10  ;;  %v1404_v29 = vsel %vm524_vm2, %v1402_v42, %v1403_v63 }
 0x118   : > { %v3553_v20 = vpop.permute.xlu1 %628  ;;  %v877_v40 = vpop.permute.xlu0 %876  ;;  %v1450_v59 = vrot.slane %v3616_v39, 2  ;;  %v1445_v42 = vrot.slane %v3616_v39, 1 }
 0x119   : > { %v997_v27 = vsel %vm989_vm11, %v984_v44, %v877_v40  ;;  %v3611_v7 = vsel %vm555_vm1, %v1423_v38, %v1425_v57  ;;  %2576 = vrot.lane.b32.xlu0 %v2575_v43, %s2869_s18  ;;  %v3620_v44 = vsel %vm376_vm0, %v483_v10, 0.0  ;;  %v907_v40 = vsel %vm898_vm4, %v3133_v31, %v627_v8 }
 0x11a   : > { %2393 = vmatmul.mubr.msk.f32.gmra.mrb[6].mxu0 %vm1014_vm12, %v997_v27  ;;  %v1449_v27 = vrot.slane %v504_v13, 2  ;;  %v2580_v38 = vpack.i.bf16 %v3616_v39, %v504_v13  ;;  %v1452_v34 = vrot.slane %v3620_v44, 2  ;;  %v2585_v31 = vpack.i.bf16 %v3403_v21, %v3364_v1 }
 0x11b   : > { %2571 = vrot.lane.b32.xlu1 %v2570_v37, %s2868_s19  ;;  %v908_v55 = vsel %vm898_vm4, %v3136_v32, %v3553_v20  ;;  %v2590_v32 = vpack.i.bf16 %v3589_v36, %v1404_v29  ;;  %v1444_v10 = vrot.slane %v504_v13, 1 }
 0x11c   : > { %v665_v24 = vpop.permute.xlu1 %664  ;;  %v663_v28 = vpop.permute.xlu0 %662  ;;  %v1451_v60 = vsel %vm555_vm1, %v1449_v27, %v1450_v59 }
 0x11d   : > { %v920_v11 = vsel %vm911_vm5, %v907_v40, %v663_v28  ;;  %2581 = vrot.lane.b32.xlu0 %v2580_v38, %s2865_s16  ;;  %v921_v33 = vsel %vm911_vm5, %v908_v55, %v665_v24  ;;  %v2595_v24 = vpack.i.bf16 %v3444_v18, %v3418_v12  ;;  %v2605_v12 = vpack.i.bf16 %v3413_v53, %v3352_v52  ;;  %v454_v40 = vld [vmem:[%s3038_s30] sm:$0xff] }
 0x11e   : > { %v3676_v52 = vsel %vm524_vm2, %v1444_v10, %v1445_v42  ;;  %v456_v38 = vmul.f32 %v454_v40, %v3220_v17  ;;  %v2635_v55 = vpack.i.bf16 %v3616_v39, %v3381_v54 }
 0x11f   : > { %1973 = vrot.lane.b32.xlu1 %v1451_v60, %s4466_s8  ;;  %v2610_v53 = vpack.i.bf16 %v3676_v52, %v3430_v61 }
 0x120   : > { %v701_v22 = vpop.permute.xlu1 %700  ;;  %v699_v0 = vpop.permute.xlu0 %698 }
 0x121   : > { %v933_v48 = vsel %vm924_vm6, %v920_v11, %v699_v0  ;;  %v3641_v0 = vsel %vm555_vm1, %v1450_v59, %v1452_v34  ;;  %v934_v43 = vsel %vm924_vm6, %v921_v33, %v701_v22  ;;  %2586 = vrot.lane.b32.xlu0 %v2585_v31, %s2863_s9  ;;  %v2620_v11 = vpack.i.bf16 %v1451_v60, %v3458_v14 }
 0x123   : > { %1975 = vrot.lane.b32.xlu1 %v3641_v0, %s4466_s8 }
 0x124   : > { %v737_v46 = vpop.permute.xlu1 %736  ;;  %v735_v16 = vpop.permute.xlu0 %734 }
 0x125   : > { %v946_v8 = vsel %vm937_vm7, %v933_v48, %v735_v16  ;;  %v947_v20 = vsel %vm937_vm7, %v934_v43, %v737_v46  ;;  %2591 = vrot.lane.b32.xlu0 %v2590_v32, %s2864_s10 }
 0x127   : > { %2596 = vrot.lane.b32.xlu1 %v2595_v24, %s2866_s13 }
 0x128   : > { %v773_v23 = vpop.permute.xlu1 %772  ;;  %v771_v15 = vpop.permute.xlu0 %770 }
 0x129   : > { %v959_v28 = vsel %vm950_vm8, %v946_v8, %v771_v15  ;;  %v960_v22 = vsel %vm950_vm8, %v947_v20, %v773_v23  ;;  %v2600_v23 = vpack.i.bf16 %v504_v13, %v3371_v5  ;;  %2606 = vrot.lane.b32.xlu0 %v2605_v12, %s2863_s9  ;;  %s2872_s9 = smov 40  }
 0x12b   : > { %2601 = vrot.lane.b32.xlu1 %v2600_v23, %s2867_s21 }
 0x12c   : > { %v809_v58 = vpop.permute.xlu1 %808  ;;  %v807_v26 = vpop.permute.xlu0 %806 }
 0x12d   : > { %v972_v41 = vsel %vm963_vm9, %v959_v28, %v807_v26  ;;  %v973_v57 = vsel %vm963_vm9, %v960_v22, %v809_v58  ;;  %v1405_v58 = vrot.slane %v3601_v47, 1  ;;  %v455_v26 = vld [vmem:[%s3038_s30 + $0x8] sm:$0xff]  ;;  %s2874_s30 = smov 64  }
 0x12e   : > { %v3684_v13 = vmul.f32 %v455_v26, %v3220_v17 }
 0x12f   : > { %v1406_v5 = vsel %vm524_vm2, %v1403_v63, %v1405_v58  ;;  %2611 = vrot.lane.b32.xlu1 %v2610_v53, %s2868_s19  ;;  %v485_v63 = vrot.slane %v456_v38, 7 }
 0x130   : > { %v845_v30 = vpop.permute.xlu1 %844  ;;  %v843_v3 = vpop.permute.xlu0 %842  ;;  %v2615_v47 = vpack.i.bf16 %v3592_v6, %v1406_v5  ;;  %v4451_v48 = vrot.slane %v3684_v13, 7 }
 0x131   : > { %v985_v1 = vsel %vm976_vm10, %v972_v41, %v843_v3  ;;  %v986_v37 = vsel %vm976_vm10, %v973_v57, %v845_v30  ;;  %v2625_v3 = vpack.i.bf16 %v3574_v56, %v3611_v7  ;;  %v3701_v14 = vsel %vm376_vm0, 0.0, %v485_v63 }
 0x132   : > { %2616 = vrot.lane.b32.xlu0 %v2615_v47, %s2864_s10  ;;  %v3698_v17 = vsel %vm376_vm0, %v485_v63, %v4451_v48  ;;  %v1469_v60 = vrot.slane %v3701_v14, 2  ;;  %v2630_v8 = vpack.i.bf16 %v3701_v14, %v3472_v4  ;;  %v3770_v63 = vld [vmem:[%s4439_s3] ss:$0 sm:$0xff] }
 0x133   : > { %2621 = vrot.lane.b32.xlu1 %v2620_v11, %s2869_s18  ;;  %v4450_v31 = vrot.slane %v3698_v17, 2 }
 0x134   : > { %v3647_v21 = vpop.permute.xlu1 %630  ;;  %v879_v16 = vpop.permute.xlu0 %878 }
 0x135   : > { %v998_v15 = vsel %vm989_vm11, %v985_v1, %v879_v16  ;;  %v1471_v56 = vsel %vm555_vm1, %v1469_v60, %v4450_v31  ;;  %v909_v41 = vsel %vm898_vm4, %v3169_v51, %v3647_v21  ;;  %v2004_v31 = vld [vmem:[%s4440_s4 + $0x38] sm:$0xff] }
 0x136   : > { %2395 = vmatprep.mubr.msk.f32.mxu0 %vm1014_vm12, %v998_v15  ;;  %1965 = vrot.lane.b32.xlu0 %v3564_v49, %s4466_s8 }
 0x137   : > { %1977 = vrot.lane.b32.xlu1 %v1471_v56, %s4466_s8 }
 0x138   : > { %v633_v2 = vpop.permute.xlu1 %632  ;;  %v881_v46 = vpop.permute.xlu0 %880 }
 0x139   : > { %v999_v18 = vsel %vm989_vm11, %v986_v37, %v881_v46  ;;  %v910_v43 = vsel %vm898_vm4, %v3166_v50, %v633_v2 }
 0x13a   : > { %2396 = vmatmul.mubr.msk.f32.gmra.mrb[8].mxu0 %vm1014_vm12, %v999_v18  ;;  %2626 = vrot.lane.b32.xlu0 %v2625_v3, %s2866_s13 }
 0x13b   : > { %2631 = vrot.lane.b32.xlu1 %v2630_v8, %s2865_s16  ;;  %v4455_v8 = vmov 0.0  }
 0x13c   : > { %v669_v27 = vpop.permute.xlu1 %668  ;;  %v667_v59 = vpop.permute.xlu0 %666 }
 0x13d   : > { %v923_v1 = vsel %vm911_vm5, %v910_v43, %v669_v27  ;;  %v922_v4 = vsel %vm911_vm5, %v909_v41, %v667_v59 }
 0x13e   : > { %2636 = vrot.lane.b32.xlu0 %v2635_v55, %s2867_s21 }
 0x140   : > { %v705_v34 = vpop.permute.xlu1 %704  ;;  %v703_v29 = vpop.permute.xlu0 %702 }
 0x141   : > { %v936_v16 = vsel %vm924_vm6, %v923_v1, %v705_v34  ;;  %v935_v54 = vsel %vm924_vm6, %v922_v4, %v703_v29  ;;  %v3759_v34 = vstv %s2949_s29  ;;  %v1447_v1 = vrot.slane %v3620_v44, 1  ;;  %s2875_s29 = smov 56  }
 0x142   : > { %vm1222_vm13 = vcmp.ge.s32.totalorder %v3759_v34, 0  ;;  %vm1228_vm14 = vcmp.lt.s32.totalorder %v3759_v34, 16 }
 0x143   : > { %vm1234_vm15 = vmand %vm1222_vm13, %vm1228_vm14 }
 0x144   : > { %v741_v30 = vpop.permute.xlu1 %740  ;;  %v739_v61 = vpop.permute.xlu0 %738  ;;  %v2336_v55 = vsel %vm1234_vm15, 1.0, %v4455_v8 }
 0x145   : > { %v949_v15 = vsel %vm937_vm7, %v936_v16, %v741_v30  ;;  %v948_v24 = vsel %vm937_vm7, %v935_v54, %v739_v61 }
 0x148   : > { %v777_v7 = vpop.permute.xlu1 %776  ;;  %v775_v49 = vpop.permute.xlu0 %774 }
 0x149   : > { %v962_v22 = vsel %vm950_vm8, %v949_v15, %v777_v7  ;;  %v961_v51 = vsel %vm950_vm8, %v948_v24, %v775_v49  ;;  %v3793_v15 = vsel %vm524_vm2, %v1445_v42, %v1447_v1 }
 0x14c   : > { %v813_v28 = vpop.permute.xlu1 %812  ;;  %v811_v33 = vpop.permute.xlu0 %810 }
 0x14d   : > { %v975_v50 = vsel %vm963_vm9, %v962_v22, %v813_v28  ;;  %v974_v21 = vsel %vm963_vm9, %v961_v51, %v811_v33 }
 0x150   : > { %v849_v32 = vpop.permute.xlu1 %848  ;;  %v847_v20 = vpop.permute.xlu0 %846 }
 0x151   : > { %v988_v57 = vsel %vm976_vm10, %v975_v50, %v849_v32  ;;  %v987_v37 = vsel %vm976_vm10, %v974_v21, %v847_v20  ;;  %v1217_v21 = vadd.s32 1, %v3759_v34 }
 0x153   : > { %vm1223_vm6 = vcmp.ge.s32.totalorder %v1217_v21, 0  ;;  %vm1229_vm8 = vcmp.lt.s32.totalorder %v1217_v21, 16 }
 0x154   : > { %v885_v2 = vpop.permute.xlu1 %884  ;;  %v883_v46 = vpop.permute.xlu0 %882  ;;  %vm1235_vm10 = vmand %vm1223_vm6, %vm1229_vm8 }
 0x155   : > { %v1001_v12 = vsel %vm989_vm11, %v988_v57, %v885_v2  ;;  %v1000_v18 = vsel %vm989_vm11, %v987_v37, %v883_v46 }
 0x156   : > { %2398 = vmatprep.mubr.msk.f32.mxu0 %vm1014_vm12, %v1000_v18 }
 0x157   : > { %2399 = vmatmul.mubr.msk.f32.gmra.mrb[10].mxu0 %vm1014_vm12, %v1001_v12 }
 0x158   : > { %v3738_v23 = vpop.permute.xlu1 %2516  ;;  %v1970_v40 = vpop.permute.xlu0 %1969 }
 0x159   : > { %v1991_v2 = vsel %vm911_vm5, %v3589_v36, %v1970_v40 }
 0x15a   : > { %2345 = vmatprep.mubr.msk.f32.mxu1 %vm937_vm7, %v1991_v2 }
 0x15c   : > { %v3740_v10 = vpop.permute.xlu1 %2521 }
 0x15d   : > { %v3748_v59 = vpop.permute.xlu0 %2546 }
 0x160   : > { %v3742_v58 = vpop.permute.xlu1 %2526 }
 0x164   : > { %v3744_v26 = vpop.permute.xlu1 %2531 }
 0x168   : > { %v3746_v27 = vpop.permute.xlu1 %2536 }
 0x17f   : > { %v3752_v53 = vpop.permute.xlu0 %1971 }
 0x181   : > { %v3750_v5 = vpop.permute.xlu1 %2541 }
 0x183   : > { %v3756_v38 = vpop.permute.xlu0 %2561 }
 0x185   : > { %v3754_v47 = vpop.permute.xlu1 %2551 }
 0x187   : > { %v3763_v11 = vpop.permute.xlu0 %2566 }
 0x189   : > { %v3761_v29 = vpop.permute.xlu1 %2556 }
 0x18b   : > { %v3775_v56 = vpop.permute.xlu0 %2576 }
 0x18d   : > { %v3772_v61 = vpop.permute.xlu1 %2571 }
 0x18f   : > { %v3781_v43 = vpop.permute.xlu0 %2581 }
 0x191   : > { %v3779_v41 = vpop.permute.xlu1 %1973 }
 0x193   : > { %v3795_v22 = vpop.permute.xlu0 %2586 }
 0x194   : > { %4469 = vst [vmem:[#allocation3_spill] sm:$0xff] %v3795_v22  ;;  %v2011_v22 = vld [vmem:[%s4440_s4 + $0x70] sm:$0xff] }
 0x195   : > { %v1976_v24 = vpop.permute.xlu1 %1975 }
 0x196   : > { %v3799_v44 = vsel %vm911_vm5, %v3793_v15, %v1976_v24 }
 0x197   : > { %4470 = vst [vmem:[#allocation4_spill] sm:$0xff] %v3799_v44  ;;  %v3808_v50 = vpop.permute.xlu0 %2591 }
 0x198   : > { %4472 = vst [vmem:[#allocation6_spill] sm:$0xff] %v3808_v50 }
 0x19b   : > { %v3810_v39 = vpop.permute.xlu0 %2606 }
 0x19c   : > { %4473 = vst [vmem:[#allocation7_spill] sm:$0xff] %v3810_v39 }
 0x19e   : > { %v2385_v30 = vpop.f32.mrb[0].mxu0 }
 0x19f   : > { %v1127_v3 = vadd.f32 %v2385_v30, %v3770_v63  ;;  %v1121_v60 = vpop.f32.mrb[1].mxu0 }
 0x1a0   : > { %v1122_v7 = vadd.f32 %v3770_v63, %v1121_v60 }
 0x1a1   : > { %vm1181_vm3 = vcmp.ge.f32.partialorder %v1127_v3, 0.0  ;;  %v1193_v49 = vmul.f32 0.1, %v1127_v3 }
 0x1a2   : > { %vm1180_vm4 = vcmp.ge.f32.partialorder %v1122_v7, 0.0  ;;  %v1192_v28 = vmul.f32 0.1, %v1122_v7 }
 0x1a3   : > { %v1205_v33 = vsel %vm1181_vm3, %v1127_v3, %v1193_v49 }
 0x1a4   : > { %v3784_v4 = vmul.f32 %v2336_v55, %v1205_v33  ;;  %v1204_v16 = vsel %vm1180_vm4, %v1122_v7, %v1192_v28  ;;  %v3812_v42 = vpop.permute.xlu0 %2616 }
 0x1a5   : > { %v3786_v54 = vmul.f32 %v2336_v55, %v1204_v16  ;;  %4474 = vst [vmem:[#allocation8_spill] sm:$0xff] %v3812_v42 }
 0x1a6   : > { %v4453_v32 = vrot.slane %v3784_v4, 7 }
 0x1a7   : > { %v4452_v20 = vrot.slane %v3786_v54, 7 }
 0x1a8   : > { %v1966_v57 = vpop.permute.xlu0 %1965 }
 0x1a9   : > { %v3806_v51 = vsel %vm376_vm0, %v4452_v20, %v4453_v32  ;;  %v1989_v37 = vsel %vm911_vm5, %v3493_v45, %v1966_v57  ;;  %v2337_v45 = vsel %vm1235_vm10, 1.0, %v4455_v8 }
 0x1aa   : > { %4471 = vst [vmem:[#allocation5_spill] sm:$0xff] %v3806_v51  ;;  %2343 = vmatprep.mubr.msk.f32.mxu0 %vm937_vm7, %v1989_v37 }
 0x1bd   : > { %v2388_v46 = vpop.f32.mrb[2].mxu0 }
 0x1be   : > { %v1137_v12 = vadd.f32 %v2388_v46, %v3770_v63  ;;  %v1131_v18 = vpop.f32.mrb[3].mxu0 }
 0x1bf   : > { %v1132_v30 = vadd.f32 %v3770_v63, %v1131_v18 }
 0x1c0   : > { %vm1183_vm12 = vcmp.ge.f32.partialorder %v1137_v12, 0.0  ;;  %v1195_v3 = vmul.f32 0.1, %v1137_v12 }
 0x1c1   : > { %vm1182_vm13 = vcmp.ge.f32.partialorder %v1132_v30, 0.0  ;;  %v1194_v60 = vmul.f32 0.1, %v1132_v30 }
 0x1c2   : > { %v1207_v7 = vsel %vm1183_vm12, %v1137_v12, %v1195_v3 }
 0x1c3   : > { %v1255_v49 = vmul.f32 %v2337_v45, %v1207_v7  ;;  %v1206_v55 = vsel %vm1182_vm13, %v1132_v30, %v1194_v60  ;;  %v1997_v7 = vld [vmem:[%s4440_s4] sm:$0xff] }
 0x1c4   : > { %v1254_v28 = vmul.f32 %v2337_v45, %v1206_v55  ;;  %v2871_v55 = vmov 0.0|0.0  }
 0x1c5   : > { %v1280_v36 = vrot.slane %v1255_v49, 7  ;;  %v1998_v49 = vld [vmem:[%s4440_s4 + $0x8] sm:$0xff]  ;;  %2436 = vmatprep.subr.bf16.mxu1 %v2871_v55  ;;  %2409 = vmatprep.subr.bf16.mxu0 %v2871_v55 }
 0x1c6   : > { %v1279_v40 = vrot.slane %v1254_v28, 7  ;;  %v2410_v28 = vpack.c.bf16 %v1998_v49, %v1997_v7  ;;  %v2001_v7 = vld [vmem:[%s4440_s4 + $0x20] sm:$0xff]  ;;  %v2002_v49 = vld [vmem:[%s4440_s4 + $0x28] sm:$0xff] }
 0x1c7   : > { %v1317_v33 = vsel %vm376_vm0, %v1280_v36, 0.0 }
 0x1c8   : > { %v1338_v1 = vrot.slane %v1317_v33, 1  ;;  %v1358_v16 = vrot.slane %v1317_v33, 2  ;;  %v3826_v24 = vsel %vm376_vm0, %v1279_v40, %v1280_v36  ;;  %v3829_v21 = vsel %vm376_vm0, 0.0, %v1279_v40  ;;  %2445 = vmatpush1.bf16.msra.mxu1 %v2410_v28  ;;  %2411 = vmatpush1.bf16.msra.mxu0 %v2410_v28  ;;  %v1999_v33 = vld [vmem:[%s4440_s4 + $0x10] sm:$0xff] }
 0x1c9   : > { %v1335_v57 = vrot.slane %v3829_v21, 1  ;;  %v1355_v37 = vrot.slane %v3829_v21, 2  ;;  %v1356_v2 = vrot.slane %v3826_v24, 2  ;;  %v1336_v46 = vrot.slane %v3826_v24, 1  ;;  %2437 = vmatprep.subr.bf16.mxu1 %v2871_v55  ;;  %2412 = vmatprep.subr.bf16.mxu0 %v2871_v55 }
 0x1ca   : > { %v1218_v36 = vadd.s32 2, %v3759_v34 }
 0x1cb   : > { %v3836_v12 = vsel %vm555_vm1, %v1355_v37, %v1356_v2  ;;  %v3839_v18 = vsel %vm555_vm1, %v1356_v2, %v1358_v16  ;;  %v3842_v30 = vsel %vm524_vm2, %v1335_v57, %v1336_v46  ;;  %v3845_v3 = vsel %vm524_vm2, %v1336_v46, %v1338_v1  ;;  %v2000_v1 = vld [vmem:[%s4440_s4 + $0x18] sm:$0xff] }
 0x1cc   : > { %v2645_v45 = vpack.i.bf16 %v3839_v18, %v3836_v12  ;;  %v2640_v60 = vpack.i.bf16 %v3845_v3, %v3842_v30  ;;  %vm1224_vm14 = vcmp.ge.s32.totalorder %v1218_v36, 0  ;;  %vm1230_vm15 = vcmp.lt.s32.totalorder %v1218_v36, 16 }
 0x1cd   : > { %vm1236_vm3 = vmand %vm1224_vm14, %vm1230_vm15  ;;  %v2413_v37 = vpack.c.bf16 %v2000_v1, %v1999_v33  ;;  %v2416_v36 = vpack.c.bf16 %v2002_v49, %v2001_v7 }
 0x1ce   : > { %2646 = vrot.lane.b32.xlu1 %v2645_v45, %s4464_s20  ;;  %2641 = vrot.lane.b32.xlu0 %v2640_v60, %s4466_s8  ;;  %v2338_v45 = vsel %vm1236_vm3, 1.0, %v4455_v8 }
 0x1cf   : > { %2446 = vmatpush1.bf16.msra.mxu1 %v2413_v37  ;;  %2414 = vmatpush1.bf16.msra.mxu0 %v2413_v37  ;;  %v2003_v37 = vld [vmem:[%s4440_s4 + $0x30] sm:$0xff] }
 0x1d0   : > { %2438 = vmatprep.subr.bf16.mxu1 %v2871_v55  ;;  %2415 = vmatprep.subr.bf16.mxu0 %v2871_v55 }
 0x1d3   : > { %2447 = vmatpush1.bf16.msra.mxu1 %v2416_v36  ;;  %2417 = vmatpush1.bf16.msra.mxu0 %v2416_v36 }
 0x1d4   : > { %2439 = vmatprep.subr.bf16.mxu1 %v2871_v55  ;;  %2418 = vmatprep.subr.bf16.mxu0 %v2871_v55 }
 0x1dd   : > { %v2391_v40 = vpop.f32.mrb[4].mxu0 }
 0x1de   : > { %v1147_v16 = vadd.f32 %v2391_v40, %v3770_v63  ;;  %v1141_v57 = vpop.f32.mrb[5].mxu0 }
 0x1df   : > { %v1142_v2 = vadd.f32 %v3770_v63, %v1141_v57 }
 0x1e0   : > { %vm1185_vm4 = vcmp.ge.f32.partialorder %v1147_v16, 0.0  ;;  %v1197_v46 = vmul.f32 0.1, %v1147_v16 }
 0x1e1   : > { %vm1184_vm6 = vcmp.ge.f32.partialorder %v1142_v2, 0.0  ;;  %v1196_v60 = vmul.f32 0.1, %v1142_v2 }
 0x1e2   : > { %v1209_v28 = vsel %vm1185_vm4, %v1147_v16, %v1197_v46  ;;  %v1219_v46 = vadd.s32 3, %v3759_v34 }
 0x1e3   : > { %v1257_v40 = vmul.f32 %v2338_v45, %v1209_v28  ;;  %v1208_v33 = vsel %vm1184_vm6, %v1142_v2, %v1196_v60  ;;  %v2419_v2 = vpack.c.bf16 %v2004_v31, %v2003_v37 }
 0x1e4   : > { %v1256_v1 = vmul.f32 %v2338_v45, %v1208_v33  ;;  %vm1225_vm8 = vcmp.ge.s32.totalorder %v1219_v46, 0  ;;  %vm1231_vm10 = vcmp.lt.s32.totalorder %v1219_v46, 16 }
 0x1e5   : > { %v1283_v57 = vrot.slane %v1257_v40, 7  ;;  %2448 = vmatpush1.bf16.msra.mxu1 %v2419_v2  ;;  %2420 = vmatpush1.bf16.msra.mxu0 %v2419_v2  ;;  %vm3926_vm12 = vmand %vm1225_vm8, %vm1231_vm10 }
 0x1e6   : > { %v1282_v16 = vrot.slane %v1256_v1, 7  ;;  %2440 = vmatprep.subr.bf16.mxu1 %v2871_v55  ;;  %v2005_v1 = vld [vmem:[%s4440_s4 + $0x40] sm:$0xff]  ;;  %2421 = vmatprep.subr.bf16.mxu0 %v2871_v55  ;;  %v2339_v19 = vsel %vm3926_vm12, 1.0, %v4455_v8 }
 0x1e7   : > { %v1318_v45 = vsel %vm376_vm0, %v1283_v57, 0.0 }
 0x1e8   : > { %v1343_v60 = vrot.slane %v1318_v45, 1  ;;  %v1363_v7 = vrot.slane %v1318_v45, 2  ;;  %v3892_v49 = vsel %vm376_vm0, %v1282_v16, %v1283_v57  ;;  %v3895_v28 = vsel %vm376_vm0, 0.0, %v1282_v16  ;;  %v2006_v57 = vld [vmem:[%s4440_s4 + $0x48] sm:$0xff] }
 0x1e9   : > { %v2650_v36 = vpack.i.bf16 %v3892_v49, %v3895_v28  ;;  %v1340_v40 = vrot.slane %v3895_v28, 1  ;;  %v1341_v33 = vrot.slane %v3892_v49, 1  ;;  %v1360_v31 = vrot.slane %v3895_v28, 2 }
 0x1ea   : > { %v1361_v37 = vrot.slane %v3892_v49, 2  ;;  %v2422_v16 = vpack.c.bf16 %v2006_v57, %v2005_v1  ;;  %v4477_v1 = vrot.slane %v3784_v4, 7 }
 0x1eb   : > { %2651 = vrot.lane.b32.xlu0 %v2650_v36, %s2860_s12  ;;  %v3913_v2 = vsel %vm524_vm2, %v1340_v40, %v1341_v33  ;;  %v3916_v45 = vsel %vm524_vm2, %v1341_v33, %v1343_v60  ;;  %v2007_v60 = vld [vmem:[%s4440_s4 + $0x50] sm:$0xff] }
 0x1ec   : > { %v2655_v48 = vpack.i.bf16 %v3916_v45, %v3913_v2  ;;  %v3921_v20 = vsel %vm555_vm1, %v1360_v31, %v1361_v37  ;;  %v3924_v32 = vsel %vm555_vm1, %v1361_v37, %v1363_v7  ;;  %2449 = vmatpush1.bf16.msra.mxu1 %v2422_v16  ;;  %v2008_v7 = vld [vmem:[%s4440_s4 + $0x58] sm:$0xff]  ;;  %2423 = vmatpush1.bf16.msra.mxu0 %v2422_v16 }
 0x1ed   : > { %v2394_v46 = vpop.f32.mrb[6].mxu0  ;;  %v2660_v36 = vpack.i.bf16 %v3924_v32, %v3921_v20  ;;  %2441 = vmatprep.subr.bf16.mxu1 %v2871_v55  ;;  %v2425_v31 = vpack.c.bf16 %v2008_v7, %v2007_v60  ;;  %2424 = vmatprep.subr.bf16.mxu0 %v2871_v55  ;;  %v2010_v60 = vld [vmem:[%s4440_s4 + $0x68] sm:$0xff] }
 0x1ee   : > { %v1157_v40 = vadd.f32 %v2394_v46, %v3770_v63  ;;  %2656 = vrot.lane.b32.xlu1 %v2655_v48, %s2862_s15  ;;  %v1151_v33 = vpop.f32.mrb[7].mxu0  ;;  %v2009_v46 = vld [vmem:[%s4440_s4 + $0x60] sm:$0xff] }
 0x1ef   : > { %v1152_v57 = vadd.f32 %v3770_v63, %v1151_v33  ;;  %2661 = vrot.lane.b32.xlu0 %v2660_v36, %s2872_s9  ;;  %v1316_v33 = vsel %vm376_vm0, %v4477_v1, 0.0  ;;  %v2428_v39 = vpack.c.bf16 %v2010_v60, %v2009_v46 }
 0x1f0   : > { %vm1187_vm13 = vcmp.ge.f32.partialorder %v1157_v40, 0.0  ;;  %v1199_v37 = vmul.f32 0.1, %v1157_v40  ;;  %2450 = vmatpush1.bf16.msra.mxu1 %v2425_v31  ;;  %2426 = vmatpush1.bf16.msra.mxu0 %v2425_v31  ;;  %v1333_v4 = vrot.slane %v1316_v33, 1 }
 0x1f1   : > { %vm1186_vm14 = vcmp.ge.f32.partialorder %v1152_v57, 0.0  ;;  %v1198_v16 = vmul.f32 0.1, %v1152_v57  ;;  %2442 = vmatprep.subr.bf16.mxu1 %v2871_v55  ;;  %2427 = vmatprep.subr.bf16.mxu0 %v2871_v55 }
 0x1f2   : > { %v1211_v7 = vsel %vm1187_vm13, %v1157_v40, %v1199_v37  ;;  %v2012_v40 = vld [vmem:[%s4440_s4 + $0x78] sm:$0xff] }
 0x1f3   : > { %v1259_v8 = vmul.f32 %v2339_v19, %v1211_v7  ;;  %v1210_v42 = vsel %vm1186_vm14, %v1152_v57, %v1198_v16  ;;  %2666 = vrot.lane.b32.xlu0 %v2655_v48, %s4466_s8  ;;  %v2431_v57 = vpack.c.bf16 %v2012_v40, %v2011_v22  ;;  %v1353_v48 = vrot.slane %v1316_v33, 2 }
 0x1f4   : > { %v1258_v50 = vmul.f32 %v2339_v19, %v1210_v42  ;;  %2451 = vmatpush1.bf16.msra.mxu1 %v2428_v39  ;;  %2429 = vmatpush1.bf16.msra.mxu0 %v2428_v39  ;;  %v1351_v42 = vrot.slane %v3806_v51, 2 }
 0x1f5   : > { %v1286_v44 = vrot.slane %v1259_v8, 7  ;;  %2443 = vmatprep.subr.bf16.mxu1 %v2871_v55  ;;  %2430 = vmatprep.subr.bf16.mxu0 %v2871_v55  ;;  %v1331_v8 = vrot.slane %v3806_v51, 1 }
 0x1f6   : > { %v1285_v31 = vrot.slane %v1258_v50, 7 }
 0x1f7   : > { %v1319_v19 = vsel %vm376_vm0, %v1286_v44, 0.0  ;;  %2671 = vrot.lane.b32.xlu0 %v2660_v36, %s4464_s20  ;;  %v2013_v36 = vld [vmem:[%s4440_s4 + $0x80] sm:$0xff]  ;;  %v1334_v51 = vsel %vm524_vm2, %v1331_v8, %v1333_v4  ;;  %v1220_v4 = vadd.s32 4, %v3759_v34 }
 0x1f8   : > { %v1348_v37 = vrot.slane %v1319_v19, 1  ;;  %v1368_v16 = vrot.slane %v1319_v19, 2  ;;  %v3972_v39 = vsel %vm376_vm0, %v1285_v31, %v1286_v44  ;;  %v3975_v50 = vsel %vm376_vm0, 0.0, %v1285_v31  ;;  %2452 = vmatpush1.bf16.msra.mxu1 %v2431_v57  ;;  %v2014_v44 = vld [vmem:[%s4440_s4 + $0x88] sm:$0xff]  ;;  %2432 = vmatpush1.bf16.msra.mxu0 %v2431_v57 }
 0x1f9   : > { %4478 = vst [vmem:[#allocation9_spill] sm:$0xff] %v3972_v39  ;;  %4479 = vst [vmem:[#allocation10_spill] sm:$0xff] %v3975_v50  ;;  %v2680_v22 = vpack.i.bf16 %v3972_v39, %v3975_v50  ;;  %v1365_v46 = vrot.slane %v3975_v50, 2  ;;  %v1366_v60 = vrot.slane %v3972_v39, 2  ;;  %v1345_v7 = vrot.slane %v3975_v50, 1  ;;  %2444 = vmatprep.subr.bf16.mxu1 %v2871_v55  ;;  %2433 = vmatprep.subr.bf16.mxu0 %v2871_v55 }
 0x1fa   : > { %v1346_v1 = vrot.slane %v3972_v39, 1  ;;  %v2434_v33 = vpack.c.bf16 %v2014_v44, %v2013_v36  ;;  %v1354_v55 = vsel %vm555_vm1, %v1351_v42, %v1353_v48  ;;  %vm1226_vm15 = vcmp.ge.s32.totalorder %v1220_v4, 0 }
 0x1fb   : > { %2681 = vrot.lane.b32.xlu0 %v2680_v22, %s2860_s12  ;;  %2676 = vrot.lane.b32.xlu1 %v2680_v22, %s2873_s17  ;;  %v1367_v40 = vsel %vm555_vm1, %v1365_v46, %v1366_v60  ;;  %v1369_v31 = vsel %vm555_vm1, %v1366_v60, %v1368_v16  ;;  %v4480_v16 = vrot.slane %v3786_v54, 7  ;;  %vm1232_vm3 = vcmp.lt.s32.totalorder %v1220_v4, 16 }
 0x1fc   : > { %v2690_v19 = vpack.i.bf16 %v1369_v31, %v1367_v40  ;;  %v1347_v57 = vsel %vm524_vm2, %v1345_v7, %v1346_v1  ;;  %v1349_v50 = vsel %vm524_vm2, %v1346_v1, %v1348_v37  ;;  %2453 = vmatpush1.bf16.msra.mxu1 %v2434_v33  ;;  %v2720_v44 = vpack.i.bf16 %v1369_v31, %v1354_v55  ;;  %vm1238_vm4 = vmand %vm1226_vm15, %vm1232_vm3 }
 0x1fd   : > { %v2685_v39 = vpack.i.bf16 %v1349_v50, %v1347_v57  ;;  %v2715_v36 = vpack.i.bf16 %v1349_v50, %v1334_v51  ;;  %2435 = vmatpush1.bf16.msra.mxu0 %v2434_v33  ;;  %v4004_v22 = vsel %vm376_vm0, 0.0, %v4480_v16  ;;  %vm1884_vm3 = vcmask 457728  }
 0x1fe   : > { %v1330_v51 = vrot.slane %v4004_v22, 1  ;;  %v1350_v48 = vrot.slane %v4004_v22, 2 }
 0x1ff   : > { %2691 = vrot.lane.b32.xlu1 %v2690_v19, %s2874_s30  ;;  %2686 = vrot.lane.b32.xlu0 %v2685_v39, %s2875_s29 }
 0x200   : > { %v1332_v37 = vsel %vm524_vm2, %v1330_v51, %v1331_v8  ;;  %v1352_v54 = vsel %vm555_vm1, %v1350_v48, %v1351_v42  ;;  %v4481_v8 = vmov 0.0  }
 0x201   : > { %v2705_v50 = vpack.i.bf16 %v1347_v57, %v1332_v37  ;;  %v2340_v31 = vsel %vm1238_vm4, 1.0, %v4481_v8  ;;  %vm1893_vm4 = vcmask 523264  }
 0x203   : > { %2716 = vrot.lane.b32.xlu1 %v2715_v36, %s4466_s8  ;;  %2696 = vrot.lane.b32.xlu0 %v2685_v39, %s2862_s15  ;;  %v2710_v39 = vpack.i.bf16 %v1367_v40, %v1352_v54 }
 0x207   : > { %2701 = vrot.lane.b32.xlu0 %v2690_v19, %s2872_s9 }
 0x20b   : > { %2706 = vrot.lane.b32.xlu0 %v2705_v50, %s4466_s8 }
 0x20d   : > { %v2397_v46 = vpop.f32.mrb[8].mxu0 }
 0x20e   : > { %v1167_v60 = vadd.f32 %v2397_v46, %v3770_v63  ;;  %v1161_v7 = vpop.f32.mrb[9].mxu0 }
 0x20f   : > { %v1162_v1 = vadd.f32 %v3770_v63, %v1161_v7  ;;  %2711 = vrot.lane.b32.xlu0 %v2710_v39, %s4464_s20 }
 0x210   : > { %vm1189_vm6 = vcmp.ge.f32.partialorder %v1167_v60, 0.0  ;;  %v1201_v33 = vmul.f32 0.1, %v1167_v60 }
 0x211   : > { %vm1188_vm8 = vcmp.ge.f32.partialorder %v1162_v1, 0.0  ;;  %v1200_v19 = vmul.f32 0.1, %v1162_v1 }
 0x212   : > { %v1213_v57 = vsel %vm1189_vm6, %v1167_v60, %v1201_v33  ;;  %vm1902_vm6 = vcmask 588800  }
 0x213   : > { %v1261_v36 = vmul.f32 %v2340_v31, %v1213_v57  ;;  %v1212_v55 = vsel %vm1188_vm8, %v1162_v1, %v1200_v19  ;;  %2721 = vrot.lane.b32.xlu0 %v2720_v44, %s4464_s20  ;;  %vm1911_vm8 = vcmask 654336   ;;  %s2312_s20 = sshll.u32 %s4504_s22, 5 }
 0x214   : > { %v1260_v42 = vmul.f32 %v2340_v31, %v1212_v55 }
 0x215   : > { %v1289_v40 = vrot.slane %v1261_v36, 7 }
 0x216   : > { %v1288_v16 = vrot.slane %v1260_v42, 7 }
 0x217   : > { %v1320_v51 = vsel %vm376_vm0, %v1289_v40, 0.0 }
 0x218   : > { %v1375_v4 = vrot.slane %v1320_v51, 1  ;;  %v1380_v48 = vrot.slane %v1320_v51, 2  ;;  %v1290_v37 = vsel %vm376_vm0, %v1288_v16, %v1289_v40  ;;  %v1314_v50 = vsel %vm376_vm0, 0.0, %v1288_v16 }
 0x219   : > { %v1372_v54 = vrot.slane %v1314_v50, 1  ;;  %v1377_v46 = vrot.slane %v1314_v50, 2  ;;  %v2730_v39 = vpack.i.bf16 %v1314_v50, %v3829_v21  ;;  %v2725_v60 = vpack.i.bf16 %v1290_v37, %v1314_v50 }
 0x21a   : > { %v1373_v7 = vrot.slane %v1290_v37, 1  ;;  %v1378_v1 = vrot.slane %v1290_v37, 2  ;;  %v2735_v57 = vpack.i.bf16 %v1290_v37, %v3826_v24  ;;  %v1221_v40 = vadd.s32 5, %v3759_v34 }
 0x21b   : > { %2731 = vrot.lane.b32.xlu1 %v2730_v39, %s2860_s12  ;;  %2726 = vrot.lane.b32.xlu0 %v2725_v60, %s2873_s17 }
 0x21c   : > { %v1374_v44 = vsel %vm524_vm2, %v1372_v54, %v1373_v7  ;;  %v1376_v33 = vsel %vm524_vm2, %v1373_v7, %v1375_v4  ;;  %v1379_v31 = vsel %vm555_vm1, %v1377_v46, %v1378_v1  ;;  %v1381_v19 = vsel %vm555_vm1, %v1378_v1, %v1380_v48 }
 0x21d   : > { %v2740_v36 = vpack.i.bf16 %v1376_v33, %v1374_v44  ;;  %v2745_v55 = vpack.i.bf16 %v1381_v19, %v1379_v31  ;;  %v2755_v42 = vpack.i.bf16 %v1379_v31, %v3836_v12  ;;  %v2750_v16 = vpack.i.bf16 %v1374_v44, %v3842_v30 }
 0x21e   : > { %vm1227_vm10 = vcmp.ge.s32.totalorder %v1221_v40, 0  ;;  %vm1233_vm12 = vcmp.lt.s32.totalorder %v1221_v40, 16  ;;  %v2760_v51 = vpack.i.bf16 %v1376_v33, %v3845_v3  ;;  %v2765_v30 = vpack.i.bf16 %v1381_v19, %v3839_v18 }
 0x21f   : > { %2736 = vrot.lane.b32.xlu0 %v2735_v57, %s2860_s12  ;;  %2741 = vrot.lane.b32.xlu1 %v2740_v36, %s2875_s29  ;;  %vm1239_vm13 = vmand %vm1227_vm10, %vm1233_vm12  ;;  %vm1920_vm10 = vcmask 719872   ;;  %vm1929_vm12 = vcmask 785408   ;;  %s2311_s12 = sshll.u32 %s4508_s28, 1 }
 0x220   : > { %v2341_v34 = vsel %vm1239_vm13, 1.0, %v4481_v8  ;;  %vm1938_vm13 = vcmask 850944  }
 0x223   : > { %2756 = vrot.lane.b32.xlu0 %v2755_v42, %s2872_s9  ;;  %2746 = vrot.lane.b32.xlu1 %v2745_v55, %s2874_s30 }
 0x227   : > { %2751 = vrot.lane.b32.xlu1 %v2750_v16, %s2862_s15 }
 0x22a   : > { %v2400_v4 = vpop.f32.mrb[10].mxu0 }
 0x22b   : > { %v1177_v48 = vadd.f32 %v2400_v4, %v3770_v63  ;;  %2761 = vrot.lane.b32.xlu1 %v2760_v51, %s2862_s15  ;;  %v1171_v12 = vpop.f32.mrb[11].mxu0  ;;  %s293_s15 = sadd.s32 %s2312_s20, %s2311_s12 }
 0x22c   : > { %v1172_v37 = vadd.f32 %v3770_v63, %v1171_v12 }
 0x22d   : > { %vm1191_vm14 = vcmp.ge.f32.partialorder %v1177_v48, 0.0  ;;  %v1203_v50 = vmul.f32 0.1, %v1177_v48 }
 0x22e   : > { %vm1190_vm15 = vcmp.ge.f32.partialorder %v1172_v37, 0.0  ;;  %v1202_v54 = vmul.f32 0.1, %v1172_v37 }
 0x22f   : > { %v1215_v46 = vsel %vm1191_vm14, %v1177_v48, %v1203_v50  ;;  %2766 = vrot.lane.b32.xlu1 %v2765_v30, %s2872_s9  ;;  %v4061_v50 = vpop.permute.xlu1 %2596  ;;  %v4482_v30 = vrot.slane %v3684_v13, 7  ;;  %v4483_v13 = vrot.slane %v3698_v17, 2  ;;  %vm1947_vm14 = vcmask 916480  }
 0x230   : > { %v1263_v3 = vmul.f32 %v2341_v34, %v1215_v46  ;;  %v1214_v39 = vsel %vm1190_vm15, %v1172_v37, %v1202_v54  ;;  %vm1956_vm15 = vcmask 982016  }
 0x231   : > { %v1262_v60 = vmul.f32 %v2341_v34, %v1214_v39  ;;  %v4071_v54 = vsel %vm376_vm0, %v4482_v30, 0.0 }
 0x232   : > { %v1292_v7 = vrot.slane %v1263_v3, 7 }
 0x233   : > { %v1291_v1 = vrot.slane %v1262_v60, 7  ;;  %v4078_v46 = vpop.permute.xlu1 %2601 }
 0x234   : > { %v1321_v44 = vsel %vm376_vm0, %v1292_v7, 0.0 }
 0x235   : > { %v1387_v33 = vrot.slane %v1321_v44, 1  ;;  %v1392_v63 = vrot.slane %v1321_v44, 2  ;;  %v1293_v31 = vsel %vm376_vm0, %v1291_v1, %v1292_v7  ;;  %v1315_v8 = vsel %vm376_vm0, 0.0, %v1291_v1 }
 0x236   : > { %v1384_v57 = vrot.slane %v1315_v8, 1  ;;  %v1389_v18 = vrot.slane %v1315_v8, 2  ;;  %v2770_v19 = vpack.i.bf16 %v1315_v8, %v3895_v28  ;;  %v1390_v36 = vrot.slane %v1293_v31, 2 }
 0x237   : > { %v1385_v55 = vrot.slane %v1293_v31, 1  ;;  %v2775_v48 = vpack.i.bf16 %v1293_v31, %v3892_v49  ;;  %vm1866_vm0 = vcmask 326656  }
 0x238   : > { %2771 = vrot.lane.b32.xlu1 %v2770_v19, %s2873_s17  ;;  %v1391_v42 = vsel %vm555_vm1, %v1389_v18, %v1390_v36  ;;  %v1393_v40 = vsel %vm555_vm1, %v1390_v36, %v1392_v63 }
 0x239   : > { %v2790_v16 = vpack.i.bf16 %v1391_v42, %v3921_v20  ;;  %v1388_v51 = vsel %vm524_vm2, %v1385_v55, %v1387_v33  ;;  %v1386_v4 = vsel %vm524_vm2, %v1384_v57, %v1385_v55  ;;  %v2785_v20 = vpack.i.bf16 %v3793_v15, %v3433_v62 }
 0x23a   : > { %v2795_v12 = vpack.i.bf16 %v1388_v51, %v3916_v45  ;;  %v2780_v37 = vpack.i.bf16 %v1386_v4, %v3913_v2  ;;  %v2800_v34 = vpack.i.bf16 %v1393_v40, %v3924_v32  ;;  %v2805_v45 = vpack.i.bf16 %v3641_v0, %v3461_v9  ;;  %v4088_v0 = vpop.permute.xlu1 %2611  ;;  %v4092_v32 = vpop.permute.xlu0 %2626 }
 0x23b   : > { %2791 = vrot.lane.b32.xlu0 %v2790_v16, %s2874_s30  ;;  %v1472_v2 = vrot.slane %v4071_v54, 2  ;;  %v2810_v62 = vpack.i.bf16 %v3698_v17, %v3469_v35 }
 0x23c   : > { %2776 = vrot.lane.b32.xlu1 %v2775_v48, %s2873_s17 }
 0x23d   : > { %v1473_v9 = vsel %vm555_vm1, %v4483_v13, %v1472_v2  ;;  %v2518_v2 = vunpack.i.l.bf16 %v3738_v23  ;;  %vm1875_vm1 = vcmask 392192  }
 0x23e   : > { %v4094_v15 = vpop.permute.xlu1 %2621  ;;  %v4096_v3 = vpop.permute.xlu0 %2636 }
 0x23f   : > { %2796 = vrot.lane.b32.xlu0 %v2795_v12, %s2875_s29 }
 0x240   : > { %2781 = vrot.lane.b32.xlu1 %v2780_v37, %s2875_s29 }
 0x242   : > { %v2642_v39 = vpop.permute.xlu0 %2641 }
 0x243   : > { %2801 = vrot.lane.b32.xlu0 %v2800_v34, %s2874_s30  ;;  %v2644_v44 = vunpack.i.h.bf16 %v2642_v39  ;;  %v2643_v33 = vunpack.i.l.bf16 %v2642_v39  ;;  %v2523_v39 = vunpack.i.l.bf16 %v3740_v10 }
 0x244   : > { %2786 = vrot.lane.b32.xlu1 %v2785_v20, %s2868_s19  ;;  %s2313_s19 = sshll.u32 %s293_s15, 3 }
 0x245   : > { %v1837_v18 = vsel %vm911_vm5, %v3826_v24, %v2644_v44  ;;  %v1836_v19 = vsel %vm911_vm5, %v3829_v21, %v2643_v33  ;;  %s4403_s11 = scalar_lea.vmem %s4442_s6, %s2313_s19 }
 0x247   : > { %2806 = vrot.lane.b32.xlu0 %v2805_v45, %s2869_s18  ;;  %v2519_v45 = vunpack.i.h.bf16 %v3738_v23 }
 0x248   : > { %1967 = vrot.lane.b32.xlu1 %v3567_v25, %s4466_s8  ;;  %v4098_v25 = vpop.permute.xlu1 %1977 }
 0x24b   : > { %1979 = vrot.lane.b32.xlu0 %v1473_v9, %s4466_s8  ;;  %v2524_v9 = vunpack.i.h.bf16 %v3740_v10 }
 0x24c   : > { %2811 = vrot.lane.b32.xlu1 %v2810_v62, %s2865_s16  ;;  %v4100_v35 = vpop.permute.xlu1 %2631 }
 0x250   : > { %v2647_v1 = vpop.permute.xlu1 %2646 }
 0x251   : > { %v2649_v8 = vunpack.i.h.bf16 %v2647_v1  ;;  %v2648_v57 = vunpack.i.l.bf16 %v2647_v1 }
 0x253   : > { %v1844_v51 = vsel %vm937_vm7, %v1836_v19, %v2648_v57  ;;  %v1845_v4 = vsel %vm937_vm7, %v1837_v18, %v2649_v8  ;;  %v2528_v18 = vunpack.i.l.bf16 %v3742_v58 }
 0x25d   : > { %v2652_v60 = vpop.permute.xlu0 %2651 }
 0x25e   : > { %v2654_v36 = vunpack.i.h.bf16 %v2652_v60  ;;  %v2653_v55 = vunpack.i.l.bf16 %v2652_v60  ;;  %v2529_v60 = vunpack.i.h.bf16 %v3742_v58  ;;  %v2539_v58 = vunpack.i.h.bf16 %v3746_v27 }
 0x260   : > { %v2657_v31 = vpop.permute.xlu1 %2656  ;;  %v1852_v48 = vsel %vm963_vm9, %v1844_v51, %v2653_v55  ;;  %v1853_v12 = vsel %vm963_vm9, %v1845_v4, %v2654_v36  ;;  %v2534_v36 = vunpack.i.h.bf16 %v3744_v26 }
 0x261   : > { %v2662_v7 = vpop.permute.xlu0 %2661  ;;  %v2659_v40 = vunpack.i.h.bf16 %v2657_v31  ;;  %v2658_v16 = vunpack.i.l.bf16 %v2657_v31 }
 0x262   : > { %v2664_v37 = vunpack.i.h.bf16 %v2662_v7  ;;  %v2663_v20 = vunpack.i.l.bf16 %v2662_v7 }
 0x263   : > { %v1860_v21 = vsel %vm989_vm11, %v1852_v48, %v2658_v16  ;;  %v1861_v30 = vsel %vm989_vm11, %v1853_v12, %v2659_v40  ;;  %v2533_v16 = vunpack.i.l.bf16 %v3744_v26 }
 0x264   : > { %v1869_v7 = vsel %vm1866_vm0, %v1860_v21, %v2663_v20  ;;  %v1870_v1 = vsel %vm1866_vm0, %v1861_v30, %v2664_v37  ;;  %v2538_v20 = vunpack.i.l.bf16 %v3746_v27  ;;  %v2544_v21 = vunpack.i.h.bf16 %v3750_v5 }
 0x265   : > { %v4102_v63 = vpop.permute.xlu0 %2666 }
 0x269   : > { %v4108_v42 = vpop.permute.xlu0 %2671 }
 0x26d   : > { %v2677_v24 = vpop.permute.xlu1 %2676  ;;  %v4114_v34 = vpop.permute.xlu0 %2681 }
 0x26e   : > { %v2679_v62 = vunpack.i.h.bf16 %v2677_v24  ;;  %v2678_v13 = vunpack.i.l.bf16 %v2677_v24 }
 0x270   : > { %v1878_v19 = vsel %vm1875_vm1, %v1869_v7, %v2678_v13  ;;  %v1879_v10 = vsel %vm1875_vm1, %v1870_v1, %v2679_v62  ;;  %v2543_v13 = vunpack.i.l.bf16 %v3750_v5  ;;  %v2548_v7 = vunpack.i.l.bf16 %v3748_v59 }
 0x271   : > { %v2692_v44 = vpop.permute.xlu1 %2691  ;;  %v2687_v33 = vpop.permute.xlu0 %2686 }
 0x272   : > { %v2694_v31 = vunpack.i.h.bf16 %v2692_v44  ;;  %v2693_v8 = vunpack.i.l.bf16 %v2692_v44  ;;  %v2689_v23 = vunpack.i.h.bf16 %v2687_v33  ;;  %v2688_v57 = vunpack.i.l.bf16 %v2687_v33 }
 0x274   : > { %v1887_v55 = vsel %vm1884_vm3, %v1878_v19, %v2688_v57  ;;  %v1888_v40 = vsel %vm1884_vm3, %v1879_v10, %v2689_v23  ;;  %v2674_v10 = vunpack.i.h.bf16 %v4108_v42 }
 0x275   : > { %v1896_v51 = vsel %vm1893_vm4, %v1887_v55, %v2693_v8  ;;  %v1897_v4 = vsel %vm1893_vm4, %v1888_v40, %v2694_v31  ;;  %v4134_v48 = vpop.permute.xlu0 %2696  ;;  %v1992_v31 = vsel %vm911_vm5, %v3592_v6, %v3752_v53  ;;  %v1993_v8 = vsel %vm911_vm5, %v3676_v52, %v3779_v41  ;;  %v4168_v57 = vpop.permute.xlu1 %2716 }
 0x276   : > { %v1905_v12 = vsel %vm1902_vm6, %v1896_v51, %v2518_v2  ;;  %v1906_v37 = vsel %vm1902_vm6, %v1897_v4, %v2519_v45  ;;  %v2669_v6 = vunpack.i.h.bf16 %v4102_v63  ;;  %v2668_v53 = vunpack.i.l.bf16 %v4102_v63 }
 0x277   : > { %v1914_v24 = vsel %vm1911_vm8, %v1905_v12, %v2523_v39  ;;  %v1915_v26 = vsel %vm1911_vm8, %v1906_v37, %v2524_v9  ;;  %v2549_v39 = vunpack.i.h.bf16 %v3748_v59  ;;  %v2684_v52 = vunpack.i.h.bf16 %v4114_v34 }
 0x278   : > { %v1923_v30 = vsel %vm1920_vm10, %v1914_v24, %v2528_v18  ;;  %v1924_v62 = vsel %vm1920_vm10, %v1915_v26, %v2529_v60  ;;  %v2683_v41 = vunpack.i.l.bf16 %v4114_v34  ;;  %v2699_v40 = vunpack.i.h.bf16 %v4134_v48 }
 0x279   : > { %v2702_v2 = vpop.permute.xlu0 %2701  ;;  %v1932_v45 = vsel %vm1929_vm12, %v1923_v30, %v2533_v16  ;;  %v1933_v27 = vsel %vm1929_vm12, %v1924_v62, %v2534_v36  ;;  %v2673_v36 = vunpack.i.l.bf16 %v4108_v42  ;;  %v2698_v16 = vunpack.i.l.bf16 %v4134_v48 }
 0x27a   : > { %v1941_v9 = vsel %vm1938_vm13, %v1932_v45, %v2538_v20  ;;  %v1942_v1 = vsel %vm1938_vm13, %v1933_v27, %v2539_v58  ;;  %v1839_v51 = vsel %vm911_vm5, %v3892_v49, %v2669_v6  ;;  %v1838_v63 = vsel %vm911_vm5, %v3895_v28, %v2668_v53 }
 0x27b   : > { %v1950_v44 = vsel %vm1947_vm14, %v1941_v9, %v2543_v13  ;;  %v1951_v60 = vsel %vm1947_vm14, %v1942_v1, %v2544_v21  ;;  %v2704_v4 = vunpack.i.h.bf16 %v2702_v2  ;;  %v2703_v58 = vunpack.i.l.bf16 %v2702_v2 }
 0x27c   : > { %v1959_v5 = vsel %vm1956_vm15, %v1950_v44, %v2548_v7  ;;  %v1960_v33 = vsel %vm1956_vm15, %v1951_v60, %v2549_v39  ;;  %v1846_v42 = vsel %vm937_vm7, %v1838_v63, %v2673_v36  ;;  %v1847_v37 = vsel %vm937_vm7, %v1839_v51, %v2674_v10 }
 0x27d   : > { %2121 = vmatmul.mubr.f32.vlgmr.msra.gmra.mrb[0].mxu1 %v1959_v5  ;;  %v4160_v59 = vpop.permute.xlu0 %2706  ;;  %v1854_v24 = vsel %vm963_vm9, %v1846_v42, %v2683_v41  ;;  %v1855_v26 = vsel %vm963_vm9, %v1847_v37, %v2684_v52  ;;  %v2554_v28 = vunpack.i.h.bf16 %v3754_v47  ;;  %v2553_v62 = vunpack.i.l.bf16 %v3754_v47 }
 0x27e   : > { %2346 = vmatprep.mubr.msk.f32.mxu1 %vm937_vm7, %v1992_v31  ;;  %v1862_v49 = vsel %vm989_vm11, %v1854_v24, %v2698_v16  ;;  %v1863_v30 = vsel %vm989_vm11, %v1855_v26, %v2699_v40  ;;  %v2564_v1 = vunpack.i.h.bf16 %v3756_v38  ;;  %v2563_v44 = vunpack.i.l.bf16 %v3756_v38 }
 0x27f   : > { %v1871_v13 = vsel %vm1866_vm0, %v1862_v49, %v2703_v58  ;;  %v1872_v2 = vsel %vm1866_vm0, %v1863_v30, %v2704_v4  ;;  %v2559_v47 = vunpack.i.h.bf16 %v3761_v29  ;;  %v2569_v6 = vunpack.i.h.bf16 %v3763_v11  ;;  %v4485_v49 = vld [vmem:[#allocation4_spill] sm:$0xff] }
 0x280   : > { %v2568_v53 = vunpack.i.l.bf16 %v3763_v11  ;;  %v2574_v36 = vunpack.i.h.bf16 %v3772_v61  ;;  %v2573_v52 = vunpack.i.l.bf16 %v3772_v61  ;;  %v2579_v40 = vunpack.i.h.bf16 %v3775_v56 }
 0x281   : > { %2126 = vmatmul.mubr.f32.gmra.mrb[2].mxu1 %v1960_v33  ;;  %v4166_v23 = vpop.permute.xlu0 %2711  ;;  %v2558_v33 = vunpack.i.l.bf16 %v3761_v29  ;;  %v2578_v16 = vunpack.i.l.bf16 %v3775_v56  ;;  %v2584_v63 = vunpack.i.h.bf16 %v3781_v43  ;;  %v2583_v4 = vunpack.i.l.bf16 %v3781_v43 }
 0x282   : > { %2347 = vmatprep.mubr.msk.f32.mxu1 %vm937_vm7, %v1993_v8  ;;  %v1457_v42 = vrot.slane %v3698_v17, 1  ;;  %v2599_v30 = vunpack.i.h.bf16 %v4061_v50 }
 0x285   : > { %v4170_v18 = vpop.permute.xlu0 %2721 }
 0x28d   : > { %v4174_v19 = vpop.permute.xlu1 %2731  ;;  %v2727_v55 = vpop.permute.xlu0 %2726 }
 0x28e   : > { %v2729_v20 = vunpack.i.h.bf16 %v2727_v55  ;;  %v2728_v34 = vunpack.i.l.bf16 %v2727_v55 }
 0x290   : > { %v1880_v27 = vsel %vm1875_vm1, %v1871_v13, %v2728_v34  ;;  %v1881_v39 = vsel %vm1875_vm1, %v1872_v2, %v2729_v20 }
 0x291   : > { %v2742_v12 = vpop.permute.xlu1 %2741 }
 0x292   : > { %v2744_v48 = vunpack.i.h.bf16 %v2742_v12  ;;  %v2743_v21 = vunpack.i.l.bf16 %v2742_v12  ;;  %v1456_v12 = vrot.slane %v3701_v14, 1 }
 0x294   : > { %v1889_v60 = vsel %vm1884_vm3, %v1880_v27, %v2743_v21  ;;  %v1890_v5 = vsel %vm1884_vm3, %v1881_v39, %v2744_v48  ;;  %v4484_v48 = vld [vmem:[#allocation3_spill] sm:$0xff]  ;;  %v1458_v17 = vsel %vm524_vm2, %v1456_v12, %v1457_v42  ;;  %v2603_v27 = vunpack.i.l.bf16 %v4078_v46 }
 0x295   : > { %v2747_v45 = vpop.permute.xlu1 %2746  ;;  %v2589_v21 = vunpack.i.h.bf16 %v4484_v48  ;;  %v2588_v14 = vunpack.i.l.bf16 %v4484_v48  ;;  %v4487_v39 = vld [vmem:[#allocation7_spill] sm:$0xff] }
 0x296   : > { %v2749_v7 = vunpack.i.h.bf16 %v2747_v45  ;;  %v2748_v9 = vunpack.i.l.bf16 %v2747_v45  ;;  %v2604_v45 = vunpack.i.h.bf16 %v4078_v46 }
 0x298   : > { %v1898_v31 = vsel %vm1893_vm4, %v1889_v60, %v2748_v9  ;;  %v1899_v8 = vsel %vm1893_vm4, %v1890_v5, %v2749_v7  ;;  %v2609_v7 = vunpack.i.h.bf16 %v4487_v39  ;;  %v2608_v9 = vunpack.i.l.bf16 %v4487_v39  ;;  %v4488_v5 = vld [vmem:[#allocation8_spill] sm:$0xff] }
 0x299   : > { %v1907_v10 = vsel %vm1902_vm6, %v1898_v31, %v2553_v62  ;;  %v1908_v38 = vsel %vm1902_vm6, %v1899_v8, %v2554_v28  ;;  %v4214_v55 = vpop.permute.xlu1 %2751  ;;  %v2598_v28 = vunpack.i.l.bf16 %v4061_v50  ;;  %v4486_v62 = vld [vmem:[#allocation6_spill] sm:$0xff]  ;;  %v2613_v60 = vunpack.i.l.bf16 %v4088_v0 }
 0x29a   : > { %v1916_v41 = vsel %vm1911_vm8, %v1907_v10, %v2558_v33  ;;  %v1917_v29 = vsel %vm1911_vm8, %v1908_v38, %v2559_v47  ;;  %v2594_v13 = vunpack.i.h.bf16 %v4486_v62  ;;  %v2593_v2 = vunpack.i.l.bf16 %v4486_v62 }
 0x29b   : > { %v1925_v11 = vsel %vm1920_vm10, %v1916_v41, %v2563_v44  ;;  %v1926_v51 = vsel %vm1920_vm10, %v1917_v29, %v2564_v1  ;;  %v2737_v1 = vpop.permute.xlu0 %2736  ;;  %v2614_v44 = vunpack.i.h.bf16 %v4088_v0  ;;  %v2619_v47 = vunpack.i.h.bf16 %v4488_v5 }
 0x29c   : > { %v1934_v61 = vsel %vm1929_vm12, %v1925_v11, %v2568_v53  ;;  %v1935_v58 = vsel %vm1929_vm12, %v1926_v51, %v2569_v6  ;;  %v1995_v33 = vsel %vm911_vm5, %v1458_v17, %v4098_v25  ;;  %v2618_v31 = vunpack.i.l.bf16 %v4488_v5 }
 0x29d   : > { %v1943_v37 = vsel %vm1938_vm13, %v1934_v61, %v2573_v52  ;;  %v1944_v56 = vsel %vm1938_vm13, %v1935_v58, %v2574_v36  ;;  %v4232_v26 = vpop.permute.xlu1 %2761  ;;  %v2624_v8 = vunpack.i.h.bf16 %v4094_v15  ;;  %v2623_v6 = vunpack.i.l.bf16 %v4094_v15 }
 0x29e   : > { %v1952_v20 = vsel %vm1947_vm14, %v1943_v37, %v2578_v16  ;;  %v1953_v34 = vsel %vm1947_vm14, %v1944_v56, %v2579_v40  ;;  %v1459_v53 = vrot.slane %v4071_v54, 1  ;;  %v2629_v10 = vunpack.i.h.bf16 %v4092_v32  ;;  %v4489_v37 = vld [vmem:[#allocation9_spill] sm:$0xff] }
 0x29f   : > { %v1961_v24 = vsel %vm1956_vm15, %v1952_v20, %v2583_v4  ;;  %v1962_v43 = vsel %vm1956_vm15, %v1953_v34, %v2584_v63  ;;  %v2628_v38 = vunpack.i.l.bf16 %v4092_v32  ;;  %v2719_v36 = vunpack.i.h.bf16 %v4168_v57  ;;  %v2757_v58 = vpop.permute.xlu0 %2756  ;;  %v4490_v56 = vld [vmem:[#allocation5_spill] sm:$0xff] }
 0x2a0   : > { %2131 = vmatmul.mubr.f32.gmra.mrb[4].mxu1 %v1961_v24  ;;  %v2718_v52 = vunpack.i.l.bf16 %v4168_v57  ;;  %v2634_v41 = vunpack.i.h.bf16 %v4100_v35  ;;  %v2633_v29 = vunpack.i.l.bf16 %v4100_v35  ;;  %v2709_v40 = vunpack.i.h.bf16 %v4160_v59 }
 0x2a1   : > { %2348 = vmatprep.mubr.msk.f32.mxu1 %vm937_vm7, %v4485_v49  ;;  %v2767_v25 = vpop.permute.xlu1 %2766  ;;  %v2708_v16 = vunpack.i.l.bf16 %v4160_v59  ;;  %v2639_v11 = vunpack.i.h.bf16 %v4096_v3  ;;  %v2714_v54 = vunpack.i.h.bf16 %v4166_v23  ;;  %v2713_v51 = vunpack.i.l.bf16 %v4166_v23 }
 0x2a2   : > { %v2724_v63 = vunpack.i.h.bf16 %v4170_v18  ;;  %v2638_v4 = vunpack.i.l.bf16 %v4096_v3  ;;  %v2723_v57 = vunpack.i.l.bf16 %v4170_v18  ;;  %v2733_v61 = vunpack.i.l.bf16 %v4174_v19 }
 0x2a3   : > { %v4273_v12 = vsel %vm524_vm2, %v1457_v42, %v1459_v53  ;;  %v1841_v59 = vsel %vm911_vm5, %v4489_v37, %v2719_v36  ;;  %v1835_v20 = vsel %vm911_vm5, %v4490_v56, %v2718_v52  ;;  %v2734_v23 = vunpack.i.h.bf16 %v4174_v19 }
 0x2a4   : > { %2136 = vmatmul.mubr.f32.gmra.mrb[6].mxu1 %v1962_v43  ;;  %v2753_v34 = vunpack.i.l.bf16 %v4214_v55  ;;  %v4491_v43 = vld [vmem:[#allocation10_spill] sm:$0xff]  ;;  %v1834_v17 = vsel %vm911_vm5, %v4004_v22, %v2708_v16  ;;  %v2738_v49 = vunpack.i.l.bf16 %v2737_v1  ;;  %v2754_v42 = vunpack.i.h.bf16 %v4214_v55 }
 0x2a5   : > { %2349 = vmatprep.mubr.msk.f32.mxu1 %vm937_vm7, %v1995_v33  ;;  %v1840_v18 = vsel %vm911_vm5, %v4491_v43, %v2709_v40  ;;  %v1842_v33 = vsel %vm937_vm7, %v1834_v17, %v2713_v51  ;;  %v1849_v36 = vsel %vm937_vm7, %v1841_v59, %v2724_v63  ;;  %v2739_v52 = vunpack.i.h.bf16 %v2737_v1 }
 0x2a6   : > { %v1848_v53 = vsel %vm937_vm7, %v1840_v18, %v2714_v54  ;;  %v1843_v19 = vsel %vm937_vm7, %v1835_v20, %v2723_v57  ;;  %v1850_v37 = vsel %vm963_vm9, %v1842_v33, %v2733_v61  ;;  %v2764_v56 = vunpack.i.h.bf16 %v4232_v26 }
 0x2a7   : > { %v2763_v40 = vunpack.i.l.bf16 %v4232_v26  ;;  %v1856_v22 = vsel %vm963_vm9, %v1848_v53, %v2734_v23  ;;  %v1858_v55 = vsel %vm989_vm11, %v1850_v37, %v2753_v34  ;;  %v2769_v16 = vunpack.i.h.bf16 %v2767_v25 }
 0x2a8   : > { %v2768_v51 = vunpack.i.l.bf16 %v2767_v25  ;;  %v1851_v54 = vsel %vm963_vm9, %v1843_v19, %v2738_v49  ;;  %v2758_v63 = vunpack.i.l.bf16 %v2757_v58  ;;  %v1864_v1 = vsel %vm989_vm11, %v1856_v22, %v2754_v42 }
 0x2a9   : > { %v1857_v61 = vsel %vm963_vm9, %v1849_v36, %v2739_v52  ;;  %v2759_v59 = vunpack.i.h.bf16 %v2757_v58  ;;  %v1859_v26 = vsel %vm989_vm11, %v1851_v54, %v2763_v40 }
 0x2aa   : > { %v2772_v24 = vpop.permute.xlu1 %2771  ;;  %v1865_v23 = vsel %vm989_vm11, %v1857_v61, %v2764_v56  ;;  %v1867_v34 = vsel %vm1866_vm0, %v1858_v55, %v2758_v63  ;;  %v1868_v53 = vsel %vm1866_vm0, %v1859_v26, %v2768_v51 }
 0x2ab   : > { %v2773_v57 = vunpack.i.l.bf16 %v2772_v24  ;;  %v2774_v20 = vunpack.i.h.bf16 %v2772_v24  ;;  %v1874_v49 = vsel %vm1866_vm0, %v1865_v23, %v2769_v16  ;;  %v1873_v42 = vsel %vm1866_vm0, %v1864_v1, %v2759_v59 }
 0x2ad   : > { %v2792_v43 = vpop.permute.xlu0 %2791  ;;  %v1876_v58 = vsel %vm1875_vm1, %v1867_v34, %v2773_v57  ;;  %v1882_v40 = vsel %vm1875_vm1, %v1873_v42, %v2774_v20 }
 0x2ae   : > { %v2777_v17 = vpop.permute.xlu1 %2776  ;;  %v2794_v56 = vunpack.i.h.bf16 %v2792_v43  ;;  %v2793_v22 = vunpack.i.l.bf16 %v2792_v43 }
 0x2af   : > { %v2778_v18 = vunpack.i.l.bf16 %v2777_v17  ;;  %v2779_v33 = vunpack.i.h.bf16 %v2777_v17 }
 0x2b1   : > { %v2797_v25 = vpop.permute.xlu0 %2796  ;;  %v1877_v55 = vsel %vm1875_vm1, %v1868_v53, %v2778_v18  ;;  %v1883_v17 = vsel %vm1875_vm1, %v1874_v49, %v2779_v33 }
 0x2b2   : > { %v2798_v19 = vunpack.i.l.bf16 %v2797_v25  ;;  %v2782_v37 = vpop.permute.xlu1 %2781  ;;  %v2799_v24 = vunpack.i.h.bf16 %v2797_v25 }
 0x2b3   : > { %v2784_v36 = vunpack.i.h.bf16 %v2782_v37  ;;  %v2783_v52 = vunpack.i.l.bf16 %v2782_v37 }
 0x2b4   : > { %v1886_v51 = vsel %vm1884_vm3, %v1877_v55, %v2798_v19  ;;  %v1892_v43 = vsel %vm1884_vm3, %v1883_v17, %v2799_v24  ;;  %v2342_v19 = vld [vmem:[%s4441_s5] ss:$0 sm:$0xff] }
 0x2b5   : > { %v1885_v16 = vsel %vm1884_vm3, %v1876_v58, %v2783_v52  ;;  %v1891_v54 = vsel %vm1884_vm3, %v1882_v40, %v2784_v36  ;;  %v2802_v63 = vpop.permute.xlu0 %2801 }
 0x2b6   : > { %v1894_v1 = vsel %vm1893_vm4, %v1885_v16, %v2793_v22  ;;  %v1900_v57 = vsel %vm1893_vm4, %v1891_v54, %v2794_v56  ;;  %v2804_v61 = vunpack.i.h.bf16 %v2802_v63  ;;  %v2803_v59 = vunpack.i.l.bf16 %v2802_v63  ;;  %v2787_v20 = vpop.permute.xlu1 %2786 }
 0x2b7   : > { %v1903_v18 = vsel %vm1902_vm6, %v1894_v1, %v2588_v14  ;;  %v1909_v26 = vsel %vm1902_vm6, %v1900_v57, %v2589_v21  ;;  %v2789_v23 = vunpack.i.h.bf16 %v2787_v20  ;;  %v2788_v39 = vunpack.i.l.bf16 %v2787_v20 }
 0x2b8   : > { %v1912_v34 = vsel %vm1911_vm8, %v1903_v18, %v2593_v2  ;;  %v1895_v33 = vsel %vm1893_vm4, %v1886_v51, %v2803_v59  ;;  %v1901_v25 = vsel %vm1893_vm4, %v1892_v43, %v2804_v61  ;;  %v1918_v53 = vsel %vm1911_vm8, %v1909_v26, %v2594_v13 }
 0x2b9   : > { %v1904_v14 = vsel %vm1902_vm6, %v1895_v33, %v2608_v9  ;;  %v1910_v48 = vsel %vm1902_vm6, %v1901_v25, %v2609_v7  ;;  %v2807_v21 = vpop.permute.xlu0 %2806  ;;  %v1921_v2 = vsel %vm1920_vm10, %v1912_v34, %v2598_v28  ;;  %v1927_v49 = vsel %vm1920_vm10, %v1918_v53, %v2599_v30 }
 0x2ba   : > { %v1913_v62 = vsel %vm1911_vm8, %v1904_v14, %v2618_v31  ;;  %v1919_v13 = vsel %vm1911_vm8, %v1910_v48, %v2619_v47  ;;  %v1968_v9 = vpop.permute.xlu1 %1967  ;;  %v2809_v7 = vunpack.i.h.bf16 %v2807_v21  ;;  %v2808_v42 = vunpack.i.l.bf16 %v2807_v21 }
 0x2bb   : > { %v1930_v28 = vsel %vm1929_vm12, %v1921_v2, %v2603_v27  ;;  %v1936_v50 = vsel %vm1929_vm12, %v1927_v49, %v2604_v45  ;;  %v1922_v30 = vsel %vm1920_vm10, %v1913_v62, %v2628_v38  ;;  %v1928_v46 = vsel %vm1920_vm10, %v1919_v13, %v2629_v10 }
 0x2bc   : > { %v1939_v5 = vsel %vm1938_vm13, %v1930_v28, %v2613_v60  ;;  %v1945_v47 = vsel %vm1938_vm13, %v1936_v50, %v2614_v44  ;;  %v1931_v27 = vsel %vm1929_vm12, %v1922_v30, %v2638_v4  ;;  %v1937_v44 = vsel %vm1929_vm12, %v1928_v46, %v2639_v11 }
 0x2bd   : > { %v1948_v45 = vsel %vm1947_vm14, %v1939_v5, %v2623_v6  ;;  %v1954_v60 = vsel %vm1947_vm14, %v1945_v47, %v2624_v8  ;;  %v1980_v31 = vpop.permute.xlu0 %1979  ;;  %v1940_v0 = vsel %vm1938_vm13, %v1931_v27, %v2788_v39  ;;  %v4492_v8 = vld [vmem:[#allocation2_spill] sm:$0xff]  ;;  %v1946_v4 = vsel %vm1938_vm13, %v1937_v44, %v2789_v23 }
 0x2be   : > { %v2812_v38 = vpop.permute.xlu1 %2811  ;;  %v1957_v32 = vsel %vm1956_vm15, %v1948_v45, %v2633_v29  ;;  %v1963_v6 = vsel %vm1956_vm15, %v1954_v60, %v2634_v41  ;;  %v1996_v15 = vsel %vm911_vm5, %v4273_v12, %v1980_v31  ;;  %v1990_v10 = vsel %vm911_vm5, %v4492_v8, %v1968_v9 }
 0x2bf   : > { %v2814_v3 = vunpack.i.h.bf16 %v2812_v38  ;;  %v2813_v11 = vunpack.i.l.bf16 %v2812_v38  ;;  %2111 = vmatmul.mubr.f32.vlgmr.msra.gmra.mrb[12].mxu0 %v1957_v32  ;;  %2141 = vmatmul.mubr.f32.gmra.mrb[8].mxu1 %v1963_v6  ;;  %v1949_v35 = vsel %vm1947_vm14, %v1940_v0, %v2808_v42  ;;  %v1955_v41 = vsel %vm1947_vm14, %v1946_v4, %v2809_v7 }
 0x2c0   : > { %2344 = vmatprep.mubr.msk.f32.mxu0 %vm937_vm7, %v1990_v10  ;;  %2350 = vmatprep.mubr.msk.f32.mxu1 %vm937_vm7, %v1996_v15 }
 0x2c1   : > { %v1958_v29 = vsel %vm1956_vm15, %v1949_v35, %v2813_v11  ;;  %v1964_v12 = vsel %vm1956_vm15, %v1955_v41, %v2814_v3 }
 0x2c3   : > { %2116 = vmatmul.mubr.f32.gmra.mrb[14].mxu0 %v1958_v29  ;;  %2146 = vmatmul.mubr.f32.gmra.mrb[10].mxu1 %v1964_v12 }
 0x350   : > { %v2122_v37 = vpop.f32.mrb[0].mxu1 }
 0x351   : > { %v2123_v58 = vadd.f32 %v2342_v19, %v2122_v37  ;;  %v2124_v24 = vpop.f32.mrb[1].mxu1 }
 0x353   : > { %vm2153_vm2 = vcmp.ge.f32.partialorder %v2123_v58, 0.0  ;;  %v2161_v36 = vmul.f32 0.1, %v2123_v58 }
 0x354   : > { %v2127_v52 = vpop.f32.mrb[2].mxu1 }
 0x355   : > { %v2169_v40 = vsel %vm2153_vm2, %v2123_v58, %v2161_v36  ;;  %v2128_v56 = vadd.f32 %v2342_v19, %v2127_v52  ;;  %v2129_v22 = vpop.f32.mrb[3].mxu1 }
 0x356   : > { %2177 = vst.msk [vmem:[%s4403_s11 + $0x10] sm:$0xff] %vm911_vm5, %v2169_v40 }
 0x357   : > { %vm2154_vm7 = vcmp.ge.f32.partialorder %v2128_v56, 0.0  ;;  %v2162_v55 = vmul.f32 0.1, %v2128_v56 }
 0x359   : > { %v2170_v17 = vsel %vm2154_vm7, %v2128_v56, %v2162_v55 }
 0x35a   : > { %2178 = vst.msk [vmem:[%s4403_s11 + $0x18] sm:$0xff] %vm911_vm5, %v2170_v17 }
 0x373   : > { %v2132_v51 = vpop.f32.mrb[4].mxu1 }
 0x374   : > { %v2133_v16 = vadd.f32 %v2342_v19, %v2132_v51  ;;  %v2134_v54 = vpop.f32.mrb[5].mxu1 }
 0x376   : > { %vm2155_vm9 = vcmp.ge.f32.partialorder %v2133_v16, 0.0  ;;  %v2163_v63 = vmul.f32 0.1, %v2133_v16 }
 0x377   : > { %v2137_v1 = vpop.f32.mrb[6].mxu1 }
 0x378   : > { %v2171_v57 = vsel %vm2155_vm9, %v2133_v16, %v2163_v63  ;;  %v2138_v61 = vadd.f32 %v2342_v19, %v2137_v1  ;;  %v2139_v59 = vpop.f32.mrb[7].mxu1 }
 0x379   : > { %2179 = vst.msk [vmem:[%s4403_s11 + $0x20] sm:$0xff] %vm911_vm5, %v2171_v57 }
 0x37a   : > { %vm2156_vm11 = vcmp.ge.f32.partialorder %v2138_v61, 0.0  ;;  %v2164_v20 = vmul.f32 0.1, %v2138_v61 }
 0x37c   : > { %v2172_v43 = vsel %vm2156_vm11, %v2138_v61, %v2164_v20 }
 0x37d   : > { %2180 = vst.msk [vmem:[%s4403_s11 + $0x28] sm:$0xff] %vm911_vm5, %v2172_v43 }
 0x392   : > { %v2112_v18 = vpop.f32.mrb[12].mxu0  ;;  %v2142_v26 = vpop.f32.mrb[8].mxu1 }
 0x393   : > { %v2113_v23 = vadd.f32 %v2342_v19, %v2112_v18  ;;  %v2143_v34 = vadd.f32 %v2342_v19, %v2142_v26  ;;  %v2114_v33 = vpop.f32.mrb[13].mxu0  ;;  %v2144_v25 = vpop.f32.mrb[9].mxu1 }
 0x395   : > { %vm2151_vm0 = vcmp.ge.f32.partialorder %v2113_v23, 0.0  ;;  %v2159_v53 = vmul.f32 0.1, %v2113_v23  ;;  %vm2157_vm1 = vcmp.ge.f32.partialorder %v2143_v34, 0.0  ;;  %v2165_v14 = vmul.f32 0.1, %v2143_v34 }
 0x396   : > { %v2117_v48 = vpop.f32.mrb[14].mxu0  ;;  %v2147_v21 = vpop.f32.mrb[10].mxu1 }
 0x397   : > { %v2167_v2 = vsel %vm2151_vm0, %v2113_v23, %v2159_v53  ;;  %v2173_v49 = vsel %vm2157_vm1, %v2143_v34, %v2165_v14  ;;  %v2118_v62 = vadd.f32 %v2342_v19, %v2117_v48  ;;  %v2148_v13 = vadd.f32 %v2342_v19, %v2147_v21  ;;  %v2119_v39 = vpop.f32.mrb[15].mxu0  ;;  %v2149_v9 = vpop.f32.mrb[11].mxu1 }
 0x398   : > { %2175 = vst.msk [vmem:[%s4403_s11] sm:$0xff] %vm911_vm5, %v2167_v2  ;;  %2181 = vst.msk [vmem:[%s4403_s11 + $0x30] sm:$0xff] %vm911_vm5, %v2173_v49 }
 0x399   : > { %vm2152_vm3 = vcmp.ge.f32.partialorder %v2118_v62, 0.0  ;;  %v2160_v7 = vmul.f32 0.1, %v2118_v62  ;;  %vm2158_vm4 = vcmp.ge.f32.partialorder %v2148_v13, 0.0  ;;  %v2166_v42 = vmul.f32 0.1, %v2148_v13 }
 0x39b   : > { %v2168_v28 = vsel %vm2152_vm3, %v2118_v62, %v2160_v7  ;;  %v2174_v50 = vsel %vm2158_vm4, %v2148_v13, %v2166_v42 }
 0x39c   : > { %2176 = vst.msk [vmem:[%s4403_s11 + $0x8] sm:$0xff] %vm911_vm5, %v2168_v28  ;;  %2182 = vst.msk [vmem:[%s4403_s11 + $0x38] sm:$0xff] %vm911_vm5, %v2174_v50 }
 0x39d PF: > { %s16_s25 = sadd.s32 1, %s2853_s25   ;;  %s4493_s21 = smov %s2845_s23 }
 0x39e   : > { %p13_p1 = scmp.ge.s32.totalorder %s16_s25, 10   ;;  %s4494_s22 = smov %s2849_s24 }
 0x39f   : > { %s4495_s23 = smov %s4498_s26  ;;  %s4496_s24 = smov %s4502_s27 }
 0x3a0   :  { %15 = sbr.rel (!%p13_p1) target bundleno = 3 (0x3), region = 85 }

</bundles_post_ra>
